<compile_context>
chip_gen: v7x
topology: tpu7x:2x2x1
jax: 0.10.0
libtpu: 0.0.40
codegen_flags: <defaults>
</compile_context>

<pallas_src>
import functools

import jax
import jax.numpy as jnp
from jax.experimental import pallas as pl
from jax.experimental.pallas import tpu as pltpu

HIDDEN = 480       # fixed by the module definition
HIDDEN_PAD = 512   # padded to 4 x 128 for aligned MXU passes


def _round_up(v, m):
    return -(-v // m) * m


def _cdiv(a, b):
    return -(-a // b)


def _device_kind():
    try:
        return jax.devices()[0].device_kind.lower()
    except Exception:
        return ""


def _paf_stage_kernel(x_ref, w1_ref, b1_ref, w2_ref, b2_ref, o_ref, *, hchunk):
    # x_ref:  (1, C_in, tpix)        f32 or bf16, pixels on the lane axis
    # w1_ref: (HIDDEN_PAD, C_in)     bf16  (conv1 weight, squeezed)
    # b1_ref: (HIDDEN_PAD, 1)        f32
    # w2_ref: (C_out, HIDDEN_PAD)    bf16  (conv2 weight, squeezed)
    # b2_ref: (C_out, 1)             f32
    # o_ref:  (1, C_out, tpix)       f32
    c_out = o_ref.shape[1]
    tpix = o_ref.shape[2]

    # No-op if x already streams as bf16; otherwise cast in VMEM (no HBM pass).
    x = x_ref[0].astype(jnp.bfloat16)                        # (C_in, tpix)

    # Start from the conv2 bias broadcast over pixels; accumulate in f32.
    acc = jnp.zeros((c_out, tpix), jnp.float32) + b2_ref[...]

    # Chunk the hidden dimension: live intermediate is only (hchunk, tpix).
    for c in range(HIDDEN_PAD // hchunk):
        lo = c * hchunk
        hi = lo + hchunk
        h = jnp.dot(w1_ref[lo:hi, :], x,
                    preferred_element_type=jnp.float32)       # (hchunk, tpix)
        h = jnp.maximum(h + b1_ref[lo:hi, :], 0.0)             # bias + ReLU (f32)
        acc = acc + jnp.dot(w2_ref[:, lo:hi], h.astype(jnp.bfloat16),
                            preferred_element_type=jnp.float32)

    o_ref[0] = acc.astype(o_ref.dtype)


def prepare_paf_stage_params(w1, b1, w2, b2):
    """One-time padding/cast of PafStage weights (hoisted out of the call path).

    w1: (480, C_in)  conv1 weight (PyTorch (480, C_in, 1, 1) squeezed)
    b1: (480,)       conv1 bias
    w2: (C_out, 480) conv2 weight (PyTorch (C_out, 480, 1, 1) squeezed)
    b2: (C_out,)     conv2 bias
    Returns padded bf16/f32 params ready for paf_stage_pallas.
    """
    C_in = w1.shape[1]
    C_out = w2.shape[0]
    w1p = jnp.zeros((HIDDEN_PAD, C_in), jnp.bfloat16)
    w1p = w1p.at[:HIDDEN, :].set(w1.astype(jnp.bfloat16))
    b1p = jnp.zeros((HIDDEN_PAD, 1), jnp.float32).at[:HIDDEN, 0].set(
        b1.astype(jnp.float32))
    w2p = jnp.zeros((C_out, HIDDEN_PAD), jnp.bfloat16)
    w2p = w2p.at[:, :HIDDEN].set(w2.astype(jnp.bfloat16))
    b2p = b2.reshape(C_out, 1).astype(jnp.float32)
    return w1p, b1p, w2p, b2p


def paf_stage_pallas(x_nchw, w1p, b1p, w2p, b2p, *, tpix_target=8192):
    """Fused PafStage forward (NCHW in, NCHW out).

    Args:
      x_nchw: (N, C_in, H, W) float32 or bfloat16
      w1p, b1p, w2p, b2p: prepared params from prepare_paf_stage_params
    Returns:
      (N, C_out, H, W) float32 with C_out = 2 * output_shape
    """
    N, C_in, H, W = x_nchw.shape
    C_out = w2p.shape[0]
    HW = H * W

    kind = _device_kind()
    is_v5 = "v5" in kind
    is_v7 = ("v7" in kind) or ("7x" in kind)
    hchunk = 128 if is_v5 else 256                 # match MXU native width
    vmem_limit = (48 if is_v7 else 64) * 1024 * 1024

    # --- Budget-driven pixel-tile selection (lane-dense, multiple of 128).
    x_bytes = jnp.dtype(x_nchw.dtype).itemsize
    weight_bytes = (HIDDEN_PAD * C_in * 2 + HIDDEN_PAD * 4
                    + C_out * HIDDEN_PAD * 2 + C_out * 4)
    budget = int(vmem_limit * 0.75) - 2 * weight_bytes
    per_pixel = 2 * C_in * x_bytes + hchunk * 4 + 3 * C_out * 4
    max_by_budget = max(128, (max(budget, per_pixel * 128) // per_pixel)
                        // 128 * 128)

    tpix_full = _round_up(HW, 128)                  # single tile per image
    target = max(_round_up(tpix_target, 128), 128)
    if tpix_full <= target and tpix_full <= max_by_budget:
        tpix = tpix_full
    else:
        tpix = max(128, min(target, max_by_budget, tpix_full))

    # v7x: make sure both TensorCores get grid steps.
    if is_v7 and N * _cdiv(HW, tpix) < 2 and HW > 128:
        tpix = max(128, _round_up(_cdiv(HW, 2), 128))

    n_tiles = _cdiv(HW, tpix)

    # NCHW -> (N, C_in, H*W): contiguous reshape, no transpose, no pad.
    x_flat = x_nchw.reshape(N, C_in, HW)

    kernel = functools.partial(_paf_stage_kernel, hchunk=hchunk)

    out = pl.pallas_call(
        kernel,
        out_shape=jax.ShapeDtypeStruct((N, C_out, HW), jnp.float32),
        grid_spec=pltpu.PrefetchScalarGridSpec(
            num_scalar_prefetch=0,
            grid=(N, n_tiles),
            in_specs=[
                pl.BlockSpec((1, C_in, tpix), lambda n, p: (n, 0, p)),      # x
                pl.BlockSpec((HIDDEN_PAD, C_in), lambda n, p: (0, 0)),      # W1
                pl.BlockSpec((HIDDEN_PAD, 1), lambda n, p: (0, 0)),         # b1
                pl.BlockSpec((C_out, HIDDEN_PAD), lambda n, p: (0, 0)),     # W2
                pl.BlockSpec((C_out, 1), lambda n, p: (0, 0)),              # b2
            ],
            out_specs=pl.BlockSpec((1, C_out, tpix), lambda n, p: (n, 0, p)),
        ),
        compiler_params=pltpu.CompilerParams(
            dimension_semantics=("parallel", "parallel"),
            vmem_limit_bytes=vmem_limit,
        ),
    )(x_flat, w1p, b1p, w2p, b2p)

    return out.reshape(N, C_out, H, W)


def init_paf_stage_params(key, input_shape, output_shape):
    """Deterministic synthetic params matching PafStage's shapes."""
    c_out = output_shape * 2
    k1, k2, k3, k4 = jax.random.split(key, 4)
    w1 = jax.random.normal(k1, (HIDDEN, input_shape), jnp.float32) * 0.05
    b1 = jax.random.normal(k2, (HIDDEN,), jnp.float32) * 0.01
    w2 = jax.random.normal(k3, (c_out, HIDDEN), jnp.float32) * 0.05
    b2 = jax.random.normal(k4, (c_out,), jnp.float32) * 0.01
    return w1, b1, w2, b2


def paf_stage_reference(x_nchw, w1, b1, w2, b2):
    """Pure-JAX reference with the same bf16-operand / f32-accum precision."""
    N, C, H, W = x_nchw.shape
    xf = x_nchw.reshape(N, C, H * W).astype(jnp.bfloat16)
    h = jnp.einsum("hc,ncp->nhp", w1.astype(jnp.bfloat16), xf,
                   preferred_element_type=jnp.float32) + b1[None, :, None]
    h = jnp.maximum(h, 0.0)
    y = jnp.einsum("oh,nhp->nop", w2.astype(jnp.bfloat16), h.astype(jnp.bfloat16),
                   preferred_element_type=jnp.float32) + b2[None, :, None]
    return y.reshape(N, -1, H, W)


if __name__ == "__main__":
    key = jax.random.PRNGKey(0)
    k_x, k_p = jax.random.split(key)

    # Small shapes consistent with the module's forward.
    N, C_in, H, W = 2, 4, 16, 16
    output_shape = 4              # conv2 out channels = 2 * output_shape = 8

    x = jax.random.normal(k_x, (N, C_in, H, W), jnp.float32)
    w1, b1, w2, b2 = init_paf_stage_params(k_p, C_in, output_shape)
    params = prepare_paf_stage_params(w1, b1, w2, b2)   # hoisted, done once

    out = paf_stage_pallas(x, *params)
    out = jax.block_until_ready(out)

    ref = paf_stage_reference(x, w1, b1, w2, b2)
    assert out.shape == (N, 2 * output_shape, H, W), out.shape
    assert jnp.allclose(out, ref, atol=1e-2, rtol=1e-2), "mismatch vs reference"

    # Ragged-HW check: H*W not a multiple of 128 exercises Pallas masking of
    # the partial last pixel tile (no wrapper pad / slice anymore).
    Hr, Wr = 15, 17
    xr = jax.random.normal(jax.random.PRNGKey(1), (1, C_in, Hr, Wr), jnp.float32)
    outr = jax.block_until_ready(paf_stage_pallas(xr, *params))
    refr = paf_stage_reference(xr, w1, b1, w2, b2)
    assert outr.shape == (1, 2 * output_shape, Hr, Wr), outr.shape
    assert jnp.allclose(outr, refr, atol=1e-2, rtol=1e-2), "ragged-HW mismatch"

    print("KERNEL_OK")
</pallas_src>

<mosaic_0001>
module attributes {stable_mosaic.version = 11 : i64} {
  func.func @_paf_stage_kernel(%arg0: i32, %arg1: i32, %arg2: memref<1x4x256xf32, #tpu.memory_space<vmem>>, %arg3: memref<512x4xbf16, #tpu.memory_space<vmem>>, %arg4: memref<512x1xf32, #tpu.memory_space<vmem>>, %arg5: memref<8x512xbf16, #tpu.memory_space<vmem>>, %arg6: memref<8x1xf32, #tpu.memory_space<vmem>>, %arg7: memref<1x8x256xf32, #tpu.memory_space<vmem>>) attributes {dimension_semantics = [#tpu.dimension_semantics<parallel>, #tpu.dimension_semantics<parallel>], iteration_bounds = array<i64: 2, 1>, scalar_prefetch = 0 : i64, scratch_operands = 0 : i64, tpu.core_type = #tpu.core_type<tc>, window_params = [{transform_indices = @transform_0, window_bounds = array<i64: 1, 4, 256>}, {pipeline_mode = #tpu.pipeline_mode<synchronous>, transform_indices = @transform_1, window_bounds = array<i64: 512, 4>}, {pipeline_mode = #tpu.pipeline_mode<synchronous>, transform_indices = @transform_2, window_bounds = array<i64: 512, 1>}, {pipeline_mode = #tpu.pipeline_mode<synchronous>, transform_indices = @transform_3, window_bounds = array<i64: 8, 512>}, {pipeline_mode = #tpu.pipeline_mode<synchronous>, transform_indices = @transform_4, window_bounds = array<i64: 8, 1>}, {transform_indices = @transform_5, window_bounds = array<i64: 1, 8, 256>}]} {
    %c0 = arith.constant 0 : index
    %c0_0 = arith.constant 0 : index
    %c0_1 = arith.constant 0 : index
    %0 = vector.load %arg2[%c0, %c0_0, %c0_1] : memref<1x4x256xf32, #tpu.memory_space<vmem>>, vector<1x4x256xf32>
    %1 = vector.shape_cast %0 : vector<1x4x256xf32> to vector<4x256xf32>
    %2 = arith.truncf %1 : vector<4x256xf32> to vector<4x256xbf16>
    %cst = arith.constant 0.000000e+00 : f32
    %3 = vector.broadcast %cst : f32 to vector<8x256xf32>
    %c0_2 = arith.constant 0 : index
    %c0_3 = arith.constant 0 : index
    %4 = vector.load %arg6[%c0_2, %c0_3] : memref<8x1xf32, #tpu.memory_space<vmem>>, vector<8x1xf32>
    %5 = vector.broadcast %4 : vector<8x1xf32> to vector<8x256xf32>
    %6 = arith.addf %3, %5 : vector<8x256xf32>
    %c0_4 = arith.constant 0 : index
    %c0_5 = arith.constant 0 : index
    %7 = vector.load %arg3[%c0_4, %c0_5] : memref<512x4xbf16, #tpu.memory_space<vmem>>, vector<256x4xbf16>
    %cst_6 = arith.constant dense<0.000000e+00> : vector<256x256xf32>
    %8 = tpu.matmul %7, %2, %cst_6 {dimension_numbers = #tpu.dot_dimension_numbers<[1], [0], [0], [1], [0, 0, 1, 1], [], []>} : vector<256x4xbf16>, vector<4x256xbf16>, vector<256x256xf32> -> vector<256x256xf32>
    %c0_7 = arith.constant 0 : index
    %c0_8 = arith.constant 0 : index
    %9 = vector.load %arg4[%c0_7, %c0_8] : memref<512x1xf32, #tpu.memory_space<vmem>>, vector<256x1xf32>
    %10 = vector.broadcast %9 : vector<256x1xf32> to vector<256x256xf32>
    %11 = arith.addf %8, %10 : vector<256x256xf32>
    %cst_9 = arith.constant 0.000000e+00 : f32
    %12 = vector.broadcast %cst_9 : f32 to vector<256x256xf32>
    %13 = arith.maximumf %11, %12 : vector<256x256xf32>
    %c0_10 = arith.constant 0 : index
    %c0_11 = arith.constant 0 : index
    %14 = vector.load %arg5[%c0_10, %c0_11] : memref<8x512xbf16, #tpu.memory_space<vmem>>, vector<8x256xbf16>
    %15 = arith.truncf %13 : vector<256x256xf32> to vector<256x256xbf16>
    %cst_12 = arith.constant dense<0.000000e+00> : vector<8x256xf32>
    %16 = tpu.matmul %14, %15, %cst_12 {dimension_numbers = #tpu.dot_dimension_numbers<[1], [0], [0], [1], [0, 0, 1, 1], [], []>} : vector<8x256xbf16>, vector<256x256xbf16>, vector<8x256xf32> -> vector<8x256xf32>
    %17 = arith.addf %6, %16 : vector<8x256xf32>
    %c256 = arith.constant 256 : index
    %c0_13 = arith.constant 0 : index
    %18 = vector.load %arg3[%c256, %c0_13] : memref<512x4xbf16, #tpu.memory_space<vmem>>, vector<256x4xbf16>
    %cst_14 = arith.constant dense<0.000000e+00> : vector<256x256xf32>
    %19 = tpu.matmul %18, %2, %cst_14 {dimension_numbers = #tpu.dot_dimension_numbers<[1], [0], [0], [1], [0, 0, 1, 1], [], []>} : vector<256x4xbf16>, vector<4x256xbf16>, vector<256x256xf32> -> vector<256x256xf32>
    %c256_15 = arith.constant 256 : index
    %c0_16 = arith.constant 0 : index
    %20 = vector.load %arg4[%c256_15, %c0_16] : memref<512x1xf32, #tpu.memory_space<vmem>>, vector<256x1xf32>
    %21 = vector.broadcast %20 : vector<256x1xf32> to vector<256x256xf32>
    %22 = arith.addf %19, %21 : vector<256x256xf32>
    %cst_17 = arith.constant 0.000000e+00 : f32
    %23 = vector.broadcast %cst_17 : f32 to vector<256x256xf32>
    %24 = arith.maximumf %22, %23 : vector<256x256xf32>
    %c0_18 = arith.constant 0 : index
    %c256_19 = arith.constant 256 : index
    %25 = vector.load %arg5[%c0_18, %c256_19] : memref<8x512xbf16, #tpu.memory_space<vmem>>, vector<8x256xbf16>
    %26 = arith.truncf %24 : vector<256x256xf32> to vector<256x256xbf16>
    %cst_20 = arith.constant dense<0.000000e+00> : vector<8x256xf32>
    %27 = tpu.matmul %25, %26, %cst_20 {dimension_numbers = #tpu.dot_dimension_numbers<[1], [0], [0], [1], [0, 0, 1, 1], [], []>} : vector<8x256xbf16>, vector<256x256xbf16>, vector<8x256xf32> -> vector<8x256xf32>
    %28 = arith.addf %17, %27 : vector<8x256xf32>
    %c0_21 = arith.constant 0 : index
    %c0_22 = arith.constant 0 : index
    %c0_23 = arith.constant 0 : index
    %29 = vector.load %arg7[%c0_21, %c0_22, %c0_23] : memref<1x8x256xf32, #tpu.memory_space<vmem>>, vector<1x8x256xf32>
    %30 = vector.shape_cast %29 : vector<1x8x256xf32> to vector<8x256xf32>
    %31 = vector.shape_cast %28 : vector<8x256xf32> to vector<1x8x256xf32>
    tpu.vector_store %arg7[%c0_21, %c0_22, %c0_23], %31 {strides = array<i32>} : memref<1x8x256xf32, #tpu.memory_space<vmem>>, vector<1x8x256xf32>,
    return
  }
  func.func @transform_0(%arg0: i32, %arg1: i32) -> (i32, i32, i32) {
    %c0_i32 = arith.constant 0 : i32
    %c0_i32_0 = arith.constant 0 : i32
    return %arg0, %c0_i32, %arg1 : i32, i32, i32
  }
  func.func @transform_1(%arg0: i32, %arg1: i32) -> (i32, i32) {
    %c0_i32 = arith.constant 0 : i32
    %c0_i32_0 = arith.constant 0 : i32
    %c0_i32_1 = arith.constant 0 : i32
    return %c0_i32, %c0_i32_0 : i32, i32
  }
  func.func @transform_2(%arg0: i32, %arg1: i32) -> (i32, i32) {
    %c0_i32 = arith.constant 0 : i32
    %c0_i32_0 = arith.constant 0 : i32
    %c0_i32_1 = arith.constant 0 : i32
    return %c0_i32, %c0_i32_0 : i32, i32
  }
  func.func @transform_3(%arg0: i32, %arg1: i32) -> (i32, i32) {
    %c0_i32 = arith.constant 0 : i32
    %c0_i32_0 = arith.constant 0 : i32
    %c0_i32_1 = arith.constant 0 : i32
    return %c0_i32, %c0_i32_0 : i32, i32
  }
  func.func @transform_4(%arg0: i32, %arg1: i32) -> (i32, i32) {
    %c0_i32 = arith.constant 0 : i32
    %c0_i32_0 = arith.constant 0 : i32
    %c0_i32_1 = arith.constant 0 : i32
    return %c0_i32, %c0_i32_0 : i32, i32
  }
  func.func @transform_5(%arg0: i32, %arg1: i32) -> (i32, i32, i32) {
    %c0_i32 = arith.constant 0 : i32
    %c0_i32_0 = arith.constant 0 : i32
    return %arg0, %c0_i32, %arg1 : i32, i32, i32
  }
}

</mosaic_0001>

<bundles_post_ra>
// kernel: tpu_custom_call.1
= control target key start
LH: loop header
LB: loop body
LE: loop exit
PB: predicated region body
PF: predicated region fallthrough
CT: control target
= control target key end

     0   :  { %10 = vsyncpa [#allocation3], 0  ;;  %s2963_s0 = inlined_call_operand.hbm [shape: f32[2,4,256], index: 0, kind: input, shape index: {}]   ;;  %s2964_s1 = inlined_call_operand.hbm [shape: bf16[512,4], index: 1, kind: input, shape index: {}]   ;;  %s2965_s2 = inlined_call_operand.hbm [shape: f32[512,1], index: 2, kind: input, shape index: {}]   ;;  %s2966_s3 = inlined_call_operand.hbm [shape: bf16[8,512], index: 3, kind: input, shape index: {}]   ;;  %s2967_s4 = inlined_call_operand.hbm [shape: f32[8,1], index: 4, kind: input, shape index: {}]   ;;  %s2968_s5 = inlined_call_operand.hbm [shape: f32[2,8,256], index: 5, kind: output, shape index: {}]  }
   0x1   :  { %12 = vsyncpa [#allocation3 + $0x1], 0 }
   0x2   :  { %13 = vsyncpa [#allocation6], 0 }
   0x3   :  { %14 = vsyncpa [#allocation9], 0 }
   0x4   :  { %15 = vsyncpa [#allocation4], 0 }
   0x5   :  { %17 = vsyncpa [#allocation4 + $0x1], 0  ;;  %s2385_s18 = smov 0   ;;  %s2387_s19 = smov 0  }
   0x6   :  { %s2389_s20 = smov 0   ;;  %s2391_s21 = smov 0  }
   0x7   :  { %s2393_s22 = smov 0   ;;  %s2395_s23 = smov 0  }
   0x8 LB: > { %s1862_s24 = sadd.s32 4294967295, %s2342_s23   ;;  %p1864_p0 = scmp.ge.s32.totalorder %s2342_s23, 1  ;;  %s2342_s23 = sphi %s2395_s23, %s23_s23   ;;  %s2338_s22 = sphi %s2393_s22, %s2992_s22   ;;  %s2334_s21 = sphi %s2391_s21, %s2991_s21   ;;  %s2330_s20 = sphi %s2389_s20, %s2990_s20   ;;  %s2326_s19 = sphi %s2387_s19, %s2989_s19   ;;  %s2322_s18 = sphi %s2385_s18, %s2988_s18  }
   0x9   : > { %p2419_p1 = scmp.eq.s32.totalorder %s1862_s24, 0  ;;  %p180_p2 = scmp.lt.s32.totalorder %s2342_s23, 3 }
   0xa   : > { %s2344_s27 = smov [#allocation5]   ;;  %s2345_s30 = smov [#allocation8]  }
   0xb   : > { %s2973_s25 = scalar_select %p2419_p1, 1, 0 }
   0xc   : > { %p2424_p3 = pnand %p1864_p0, %p180_p2  ;;  %s192_s28 = sshll.u32 %s2344_s27, 4  ;;  %s2428_s28 = int_to_ptr.vmem [resolvable:$true] %s192_s28 }
   0xd   : > { %s219_s6 = sshll.u32 %s2345_s30, 4  ;;  %s2346_s7 = smov [#allocation7]   ;;  %s2439_s6 = int_to_ptr.vmem [resolvable:$true] %s219_s6 }
   0xe   : > { %s2974_s26 = scalar_select %p2424_p3, 1, 0 }
   0xf   : > { %p1981_p4 = pneg %p2424_p3  ;;  %s2441_s8 = sshll.u32 %s2346_s7, 4  ;;  %s206_s8 = int_to_ptr.vmem [resolvable:$true] %s2441_s8 }
  0x10   : > { %s2110_s11 = scalar_lea.hbm %s2964_s1, 4096 }
  0x11   : > { %p2435_p6 = pnand %p1981_p4, %p2419_p1  ;;  %p2111_p7 = scmp.ne.s32.totalorder %s2964_s1, %s2110_s11 }
  0x12   : > { %p2117_p11 = scmp.lt.u32.totalorder %s2110_s11, %s2964_s1 }
  0x13   : > { %p2451_p8 = pneg %p2435_p6 }
  0x15   : > { %p2113_p9 = pnand %p2451_p8, %p2111_p7 }
  0x17   : > { %p2114_p10 = pneg %p2113_p9 }
  0x19   : > { %p2119_p12 = pnand %p2117_p11, %p2114_p10 }
  0x1b   : > { %2122 = shalt.err (!%p2119_p12)
}
  0x1c   : > { %s2123_s17 = scalar_lea.vmem %s2428_s28, 4096  ;;  %p2131_p4 = scmp.lt.s32.totalorder %s2428_s28, %s2428_s28 }
  0x1d   : > { %p2124_p13 = scmp.ne.s32.totalorder %s2428_s28, %s2123_s17  ;;  %p2132_p5 = scmp.lt.s32.totalorder %s2123_s17, %s2123_s17 }
  0x1f   : > { %p2126_p0 = pnand %p2124_p13, %p2451_p8  ;;  %p2133_p7 = por %p2132_p5, %p2131_p4 }
  0x21   : > { %p2127_p2 = pneg %p2126_p0 }
  0x23   : > { %p2134_p9 = pnand %p2133_p7, %p2127_p2 }
  0x25   : > { %2137 = shalt.err (!%p2134_p9)
}
  0x26   : > { %s2347_s27 = smov 64   ;;  %s2348_s30 = smov 4  }
  0x27   : > { %1984 = dma.hbm_to_vmem [thread:$0]  (!%p2435_p6), %s2964_s1, 4096, %s2428_s28, [#allocation6], %s2347_s27, %s2347_s27, %s2348_s30  }
  0x28   : > { %s2138_s12 = scalar_lea.hbm %s2966_s3, 256 }
  0x29   : > { %p2139_p5 = scmp.ne.s32.totalorder %s2966_s3, %s2138_s12  ;;  %p2145_p12 = scmp.lt.u32.totalorder %s2138_s12, %s2966_s3 }
  0x2b   : > { %p2141_p10 = pnand %p2139_p5, %p2451_p8 }
  0x2d   : > { %p2142_p11 = pneg %p2141_p10 }
  0x2f   : > { %p2147_p13 = pnand %p2145_p12, %p2142_p11 }
  0x31   : > { %2150 = shalt.err (!%p2147_p13)
}
  0x32   : > { %s2151_s28 = scalar_lea.vmem %s2439_s6, 256  ;;  %p2159_p7 = scmp.lt.s32.totalorder %s2439_s6, %s2439_s6 }
  0x33   : > { %p2152_p0 = scmp.ne.s32.totalorder %s2439_s6, %s2151_s28  ;;  %p2160_p9 = scmp.lt.s32.totalorder %s2151_s28, %s2151_s28 }
  0x35   : > { %p2154_p2 = pnand %p2152_p0, %p2451_p8  ;;  %p2161_p5 = por %p2160_p9, %p2159_p7 }
  0x37   : > { %p2155_p4 = pneg %p2154_p2 }
  0x39   : > { %p2162_p10 = pnand %p2161_p5, %p2155_p4 }
  0x3b   : > { %2165 = shalt.err (!%p2162_p10)
}
  0x3c   : > { %1990 = dma.hbm_to_vmem [thread:$0]  (!%p2435_p6), %s2966_s3, 256, %s2439_s6, [#allocation9]  }
  0x3d   : > { %s2166_s10 = scalar_lea.hbm %s2965_s2, 8192 }
  0x3e   : > { %p2167_p11 = scmp.ne.s32.totalorder %s2965_s2, %s2166_s10  ;;  %p2173_p0 = scmp.lt.u32.totalorder %s2166_s10, %s2965_s2 }
  0x40   : > { %p2169_p12 = pnand %p2167_p11, %p2451_p8 }
  0x42   : > { %p2170_p13 = pneg %p2169_p12 }
  0x44   : > { %p2175_p2 = pnand %p2173_p0, %p2170_p13 }
  0x46   : > { %2178 = shalt.err (!%p2175_p2)
}
  0x47   : > { %s2179_s16 = scalar_lea.vmem %s206_s8, 8192  ;;  %p2187_p5 = scmp.lt.s32.totalorder %s206_s8, %s206_s8 }
  0x48   : > { %p2180_p4 = scmp.ne.s32.totalorder %s206_s8, %s2179_s16  ;;  %p2188_p10 = scmp.lt.s32.totalorder %s2179_s16, %s2179_s16 }
  0x4a   : > { %p2182_p7 = pnand %p2180_p4, %p2451_p8  ;;  %p2189_p3 = por %p2188_p10, %p2187_p5 }
  0x4c   : > { %p2183_p9 = pneg %p2182_p7 }
  0x4e   : > { %p2190_p1 = pnand %p2189_p3, %p2183_p9 }
  0x50   : > { %2193 = shalt.err (!%p2190_p1)
}
  0x51   : > { %s2349_s6 = smov 128   ;;  %s2350_s17 = smov 8  }
  0x52   : > { %1987 = dma.hbm_to_vmem [thread:$0]  (!%p2435_p6), %s2965_s2, 8192, %s206_s8, [#allocation6], %s2349_s6, %s2349_s6, %s2350_s17  }
  0x53   : > { %s2351_s30 = smov [#allocation10]   ;;  %s2194_s11 = scalar_lea.hbm %s2967_s4, 128 }
  0x54   : > { %s230_s7 = sshll.u32 %s2351_s30, 4  ;;  %p2195_p1 = scmp.ne.s32.totalorder %s2967_s4, %s2194_s11  ;;  %s231_s7 = int_to_ptr.vmem [resolvable:$true] %s230_s7 }
  0x55   : > { %p2201_p12 = scmp.lt.u32.totalorder %s2194_s11, %s2967_s4 }
  0x56   : > { %p2197_p3 = pnand %p2195_p1, %p2451_p8 }
  0x58   : > { %p2198_p11 = pneg %p2197_p3 }
  0x5a   : > { %p2203_p13 = pnand %p2201_p12, %p2198_p11 }
  0x5c   : > { %2206 = shalt.err (!%p2203_p13)
}
  0x5d   : > { %s2207_s8 = scalar_lea.vmem %s231_s7, 128  ;;  %p2215_p7 = scmp.lt.s32.totalorder %s231_s7, %s231_s7 }
  0x5e   : > { %p2208_p0 = scmp.ne.s32.totalorder %s231_s7, %s2207_s8  ;;  %p2216_p9 = scmp.lt.s32.totalorder %s2207_s8, %s2207_s8 }
  0x60   : > { %p2210_p2 = pnand %p2208_p0, %p2451_p8  ;;  %p2217_p5 = por %p2216_p9, %p2215_p7 }
  0x62   : > { %p2211_p4 = pneg %p2210_p2 }
  0x64   : > { %p2218_p10 = pnand %p2217_p5, %p2211_p4 }
  0x66   : > { %2221 = shalt.err (!%p2218_p10)
}
  0x67   : > { %1993 = dma.hbm_to_vmem [thread:$0]  (!%p2435_p6), %s2967_s4, 128, %s231_s7, [#allocation9]  }
  0x68   : > { %s1863_s14 = sadd.s32 4294967294, %s2342_s23   ;;  %s35_s28 = sadd.s32 1, %s2338_s22 }
  0x69   : > { %p37_p8 = scmp.ge.s32.totalorder %s35_s28, 2  ;;  %s44_s29 = sadd.s32 1, %s2330_s20 }
  0x6a   : > { %p51_p1 = scmp.ne.s32.totalorder %s2330_s20, %s2326_s19  ;;  %p52_p3 = scmp.eq.s32.totalorder %s2342_s23, 0 }
  0x6b   : > { %s2994_s28 = smov (%p37_p8, %s35_s28), 0  ;;  %p57_p12 = scmp.ne.s32.totalorder %s2326_s19, %s2322_s18 }
  0x6c   : > { %p2540_p11 = por %p52_p3, %p51_p1  ;;  %s39_s30 = ssub.s32 %s2338_s22, %s2994_s28 }
  0x6d   : > { %p167_p6 = scmp.eq.s32.totalorder %s1862_s24, 1  ;;  %p42_p13 = scmp.eq.s32.totalorder %s39_s30, 0 }
  0x6e   : > { %p2978_p0 = scmp.ne.s32.totalorder %s2973_s25, 0  ;;  %p173_p7 = scmp.eq.s32.totalorder %s1863_s14, 1 }
  0x6f   : > { %p2556_p4 = por %p167_p6, %p51_p1  ;;  %p2006_p5 = scmp.lt.s32.totalorder %s2342_s23, 2 }
  0x70   : > { %p2552_p2 = por %p2978_p0, %p57_p12  ;;  %p2563_p9 = por %p173_p7, %p57_p12 }
  0x71   : > { %s2980_s9 = scalar_select %p2556_p4, 1, 0 }
  0x72   : > { %s2561_s10 = scalar_select %p42_p13, %s2330_s20, %s44_s29  }
  0x73   : > { %s2981_s11 = scalar_select %p2563_p9, 1, 0 }
  0x74   : > { %s241_s12 = sand.u32 1, %s2330_s20   ;;  %s1955_s24 = sshll.u32 %s2338_s22, 7 }
  0x75   : > { %s1870_s13 = sshll.u32 %s241_s12, 3  ;;  %s2573_s8 = scalar_lea.hbm %s2963_s0, %s1955_s24 }
  0x76   : > { %s245_s6 = scalar_lea.vmem [#allocation2], %s1870_s13  ;;  %p2577_p10 = pnand %p2006_p5, %p2540_p11 }
  0x77   : > { %s255_s17 = sshll.u32 %s245_s6, 4  ;;  %s242_s29 = scalar_lea.sflag [#allocation3], %s241_s12  ;;  %s2581_s17 = int_to_ptr.vmem [resolvable:$true] %s255_s17 }
  0x78   : > { %s2222_s30 = scalar_lea.hbm %s2573_s8, 128  ;;  %p2224_p1 = pneg %p2577_p10 }
  0x79   : > { %p2223_p8 = scmp.ne.s32.totalorder %s2573_s8, %s2222_s30  ;;  %s2227_s27 = scalar_lea.hbm %s2963_s0, 256 }
  0x7a   : > { %p2228_p11 = scmp.lt.u32.totalorder %s2573_s8, %s2963_s0  ;;  %p2229_p6 = scmp.lt.u32.totalorder %s2227_s27, %s2222_s30 }
  0x7b   : > { %p2225_p3 = pnand %p2224_p1, %p2223_p8  ;;  %p2231_p0 = scmp.lt.u32.totalorder %s2222_s30, %s2573_s8 }
  0x7c   : > { %p2230_p13 = por %p2229_p6, %p2228_p11 }
  0x7d   : > { %p2226_p12 = pneg %p2225_p3 }
  0x7e   : > { %p2232_p7 = por %p2231_p0, %p2230_p13 }
  0x80   : > { %p2233_p5 = pnand %p2232_p7, %p2226_p12 }
  0x82   : > { %2236 = shalt.err (!%p2233_p5)
}
  0x83   : > { %s2237_s12 = scalar_lea.vmem %s2581_s17, 128  ;;  %s2352_s6 = smov [#allocation2]  }
  0x84   : > { %p2238_p8 = scmp.ne.s32.totalorder %s2581_s17, %s2237_s12  ;;  %s2242_s24 = sshll.u32 %s2352_s6, 4  ;;  %s2243_s24 = int_to_ptr.vmem [resolvable:$false] %s2242_s24 }
  0x85   : > { %s2244_s13 = scalar_lea.vmem %s2243_s24, 256  ;;  %p2245_p4 = scmp.lt.s32.totalorder %s2581_s17, %s2243_s24 }
  0x86   : > { %p2240_p3 = pnand %p2238_p8, %p2224_p1  ;;  %p2246_p11 = scmp.lt.s32.totalorder %s2244_s13, %s2237_s12 }
  0x88   : > { %p2241_p9 = pneg %p2240_p3  ;;  %p2247_p6 = por %p2246_p11, %p2245_p4 }
  0x8a   : > { %p2248_p13 = pnand %p2247_p6, %p2241_p9 }
  0x8c   : > { %2251 = shalt.err (!%p2248_p13)
}
  0x8d   : > { %1997 = dma.hbm_to_vmem [thread:$0]  (!%p2577_p10), %s2573_s8, 128, %s2581_s17, %s242_s29  }
  0x8e   : > { %p2983_p12 = scmp.ne.s32.totalorder %s2974_s26, 0 }
  0x8f   : > { %s2611_s30 = sand.u32 (!%p2983_p12), 1, %s2326_s19  }
  0x90   : > { %264 = sbr.rel (%p2983_p12) target bundleno = 745 (0x2e9), region = 40  ;;  %s1874_s27 = sshll.u32 (!%p2983_p12), %s2611_s30, 3 }
  0x91   : > { %s267_s15 = scalar_lea.sflag (!%p2983_p12), [#allocation3], %s2611_s30  ;;  %s270_s16 = scalar_lea.vmem (!%p2983_p12), [#allocation2], %s1874_s27 }
  0x97   : > { %2305 = dma.done.wait (%p2552_p2), %s267_s15, 128  }
  0x98   : > { %2307 = vsyncadd (%p2552_p2), %s267_s15, 4294967168  ;;  %p2984_p4 = scmp.ne.s32.totalorder %s2973_s25, 0 }
  0x9a   : > { %2309 = dma.done.wait (%p2984_p4), [#allocation6], 12288  }
  0x9b   : > { %2311 = vsyncadd (%p2984_p4), [#allocation6], 4294955008 }
  0x9c   : > { %2313 = dma.done.wait (%p2984_p4), [#allocation9], 384  }
  0x9d   : > { %2315 = vsyncadd (%p2984_p4), [#allocation9], 4294966912  ;;  %v2353_v0 = vmov 0   ;;  %v1061_v1 = vld [vmem:[#allocation7 + $0x100] sm:$0xff]  ;;  %v1062_v3 = vld [vmem:[#allocation7 + $0x108] sm:$0xff]  ;;  %vm682_vm0 = vcmask 1041408  }
  0x9e   : > { %2070 = vset.pattern.permute.xlu1 %v2353_v0  ;;  %2069 = vset.pattern.permute.xlu0 %v2353_v0  ;;  %v361_v2 = vld [vmem:[#allocation7] sm:$0xff]  ;;  %v316_v4 = vld [vmem:[%s270_s16] sm:$0xff]  ;;  %v362_v5 = vld [vmem:[#allocation7 + $0x8] sm:$0xff]  ;;  %vm633_vm1 = vcmask 31744   ;;  %s1879_s25 = sshll.u32 %s2611_s30, 4  ;;  %s1956_s26 = sshll.u32 %s2334_s21, 8 }
  0x9f   : > { %721 = vmatprep.mubr.bf16.mxu0 %v2353_v0  ;;  %1413 = vmatprep.mubr.bf16.mxu1 %v2353_v0  ;;  %v318_v6 = vcombine.high %v316_v4, %v316_v4  ;;  %v320_v7 = vpack.c.bf16 %v316_v4, %v316_v4  ;;  %v364_v10 = vld [vmem:[#allocation7 + $0x18] sm:$0xff]  ;;  %v363_v11 = vld [vmem:[#allocation7 + $0x10] sm:$0xff]  ;;  %v2072_v12 = vld [vmem:[#allocation5] sm:$0xff]   ;;  %s312_s7 = scalar_lea.vmem [#allocation11], %s1879_s25  ;;  %s2914_s29 = scalar_lea.hbm %s2968_s5, %s1956_s26 }
  0xa0   : > { %1095 = vperm.xlu1 %2070, %v1061_v1   ;;  %395 = vperm.xlu0 %2069, %v361_v2   ;;  %v2073_v13 = vld [vmem:[#allocation5 + $0x80] sm:$0xff]   ;;  %v1064_v14 = vld [vmem:[#allocation7 + $0x118] sm:$0xff]  ;;  %v1063_v15 = vld [vmem:[#allocation7 + $0x110] sm:$0xff]  ;;  %s1740_s8 = sshll.u32 %s312_s7, 4  ;;  %s1724_s21 = scalar_lea.sflag [#allocation4], %s2611_s30  ;;  %s2916_s8 = int_to_ptr.vmem [resolvable:$true] %s1740_s8 }
  0xa1   : > { %v321_v8 = vpack.c.bf16 %v318_v6, %v318_v6  ;;  %v684_v9 = vsel %vm682_vm0, %v320_v7, 0  ;;  %v366_v16 = vld [vmem:[#allocation7 + $0x28] sm:$0xff]  ;;  %v365_v17 = vld [vmem:[#allocation7 + $0x20] sm:$0xff]  ;;  %v368_v22 = vld [vmem:[#allocation7 + $0x38] sm:$0xff]  ;;  %s2252_s12 = scalar_lea.vmem %s2916_s8, 256  ;;  %p2985_p9 = scmp.ne.s32.totalorder %s2980_s9, 0 }
  0xa2   : > { %v2074_v18 = vld [vmem:[#allocation5 + $0x8] sm:$0xff]   ;;  %v1065_v21 = vld [vmem:[#allocation7 + $0x120] sm:$0xff]  ;;  %v367_v23 = vld [vmem:[#allocation7 + $0x30] sm:$0xff]  ;;  %p2253_p2 = scmp.ne.s32.totalorder %s2916_s8, %s2252_s12  ;;  %s2354_s6 = smov [#allocation11]  }
  0xa3   : > { %1896 = vmatprep.subr.msk.bf16.mxu0 %vm682_vm0, %v321_v8  ;;  %1931 = vmatprep.subr.msk.bf16.mxu1 %vm682_vm0, %v321_v8  ;;  %v2075_v19 = vld [vmem:[#allocation5 + $0x88] sm:$0xff]   ;;  %v2076_v24 = vld [vmem:[#allocation5 + $0x10] sm:$0xff]   ;;  %v1068_v26 = vld [vmem:[#allocation7 + $0x138] sm:$0xff]  ;;  %s2256_s24 = sshll.u32 %s2354_s6, 4  ;;  %s2257_s24 = int_to_ptr.vmem [resolvable:$false] %s2256_s24 }
  0xa4   : > { %1100 = vperm.xlu1 %2070, %v1062_v3   ;;  %400 = vperm.xlu0 %2069, %v362_v5   ;;  %v1066_v20 = vld [vmem:[#allocation7 + $0x128] sm:$0xff]  ;;  %v2077_v25 = vld [vmem:[#allocation5 + $0x90] sm:$0xff]   ;;  %v369_v29 = vld [vmem:[#allocation7 + $0x40] sm:$0xff]  ;;  %p2254_p10 = pnand %p2253_p2, %p2985_p9  ;;  %s2258_s13 = scalar_lea.vmem %s2257_s24, 512 }
  0xa5   : > { %690 = vmatpush1.bf16.msra.mxu0 %v684_v9  ;;  %1382 = vmatpush1.bf16.msra.mxu1 %v684_v9  ;;  %v1067_v27 = vld [vmem:[#allocation7 + $0x130] sm:$0xff]  ;;  %v370_v28 = vld [vmem:[#allocation7 + $0x48] sm:$0xff]  ;;  %v2078_v30 = vld [vmem:[#allocation5 + $0x18] sm:$0xff]   ;;  %p2259_p0 = scmp.lt.s32.totalorder %s2916_s8, %s2257_s24  ;;  %p2260_p7 = scmp.lt.s32.totalorder %s2258_s13, %s2252_s12 }
  0xa6   : > { %v2079_v31 = vld [vmem:[#allocation5 + $0x98] sm:$0xff]   ;;  %v1070_v32 = vld [vmem:[#allocation7 + $0x148] sm:$0xff]  ;;  %v1069_v33 = vld [vmem:[#allocation7 + $0x140] sm:$0xff]  ;;  %p2255_p1 = pneg %p2254_p10 }
  0xa7   : > { %v372_v34 = vld [vmem:[#allocation7 + $0x58] sm:$0xff]  ;;  %v371_v35 = vld [vmem:[#allocation7 + $0x50] sm:$0xff]  ;;  %v2080_v36 = vld [vmem:[#allocation5 + $0x20] sm:$0xff]   ;;  %p2261_p5 = por %p2260_p7, %p2259_p0 }
  0xa8   : > { %410 = vperm.xlu1 %2070, %v364_v10   ;;  %405 = vperm.xlu0 %2069, %v363_v11   ;;  %v2081_v37 = vld [vmem:[#allocation5 + $0xa0] sm:$0xff]   ;;  %v1072_v38 = vld [vmem:[#allocation7 + $0x158] sm:$0xff]  ;;  %v1071_v39 = vld [vmem:[#allocation7 + $0x150] sm:$0xff] }
  0xa9   : > { %1897 = vmatmul.mubr.msk.bf16.vlgmr.msra.gmra.mrb[0].mxu0 %vm633_vm1, %v2072_v12  ;;  %1932 = vmatmul.mubr.msk.bf16.vlgmr.msra.gmra.mrb[0].mxu1 %vm633_vm1, %v2073_v13  ;;  %v374_v40 = vld [vmem:[#allocation7 + $0x68] sm:$0xff]  ;;  %v373_v41 = vld [vmem:[#allocation7 + $0x60] sm:$0xff]  ;;  %v376_v46 = vld [vmem:[#allocation7 + $0x78] sm:$0xff]  ;;  %p2262_p8 = pnand %p2261_p5, %p2255_p1 }
  0xaa   : > { %731 = vmatprep.mubr.bf16.mxu0 %v2353_v0  ;;  %1423 = vmatprep.mubr.bf16.mxu1 %v2353_v0  ;;  %v2082_v42 = vld [vmem:[#allocation5 + $0x28] sm:$0xff]   ;;  %v1073_v45 = vld [vmem:[#allocation7 + $0x160] sm:$0xff]  ;;  %v375_v47 = vld [vmem:[#allocation7 + $0x70] sm:$0xff] }
  0xab   : > { %v2083_v43 = vld [vmem:[#allocation5 + $0xa8] sm:$0xff]   ;;  %v2084_v48 = vld [vmem:[#allocation5 + $0x30] sm:$0xff]   ;;  %v1076_v50 = vld [vmem:[#allocation7 + $0x178] sm:$0xff] }
  0xac   : > { %1110 = vperm.xlu1 %2070, %v1064_v14   ;;  %1105 = vperm.xlu0 %2069, %v1063_v15   ;;  %v1074_v44 = vld [vmem:[#allocation7 + $0x168] sm:$0xff]  ;;  %v2085_v49 = vld [vmem:[#allocation5 + $0xb0] sm:$0xff]   ;;  %v377_v53 = vld [vmem:[#allocation7 + $0x80] sm:$0xff] }
  0xad   : > { %v1075_v51 = vld [vmem:[#allocation7 + $0x170] sm:$0xff]  ;;  %v378_v52 = vld [vmem:[#allocation7 + $0x88] sm:$0xff]  ;;  %v2086_v54 = vld [vmem:[#allocation5 + $0x38] sm:$0xff]  }
  0xae   : > { %v2087_v55 = vld [vmem:[#allocation5 + $0xb8] sm:$0xff]   ;;  %v1078_v56 = vld [vmem:[#allocation7 + $0x188] sm:$0xff]  ;;  %v1077_v57 = vld [vmem:[#allocation7 + $0x180] sm:$0xff] }
  0xaf   : > { %v380_v58 = vld [vmem:[#allocation7 + $0x98] sm:$0xff]  ;;  %v379_v59 = vld [vmem:[#allocation7 + $0x90] sm:$0xff]  ;;  %v2088_v60 = vld [vmem:[#allocation5 + $0x40] sm:$0xff]  }
  0xb0   : > { %420 = vperm.xlu1 %2070, %v366_v16   ;;  %415 = vperm.xlu0 %2069, %v365_v17   ;;  %v2089_v61 = vld [vmem:[#allocation5 + $0xc0] sm:$0xff]   ;;  %v1080_v62 = vld [vmem:[#allocation7 + $0x198] sm:$0xff]  ;;  %v1079_v63 = vld [vmem:[#allocation7 + $0x190] sm:$0xff] }
  0xb1   : > { %1898 = vmatmul.mubr.msk.bf16.gmra.mrb[4].mxu0 %vm633_vm1, %v2074_v18  ;;  %1933 = vmatmul.mubr.msk.bf16.gmra.mrb[4].mxu1 %vm633_vm1, %v2075_v19  ;;  %v382_v1 = vld [vmem:[#allocation7 + $0xa8] sm:$0xff]  ;;  %v381_v2 = vld [vmem:[#allocation7 + $0xa0] sm:$0xff]  ;;  %v384_v7 = vld [vmem:[#allocation7 + $0xb8] sm:$0xff] }
  0xb2   : > { %741 = vmatprep.mubr.bf16.mxu0 %v2353_v0  ;;  %1433 = vmatprep.mubr.bf16.mxu1 %v2353_v0  ;;  %v2090_v3 = vld [vmem:[#allocation5 + $0x48] sm:$0xff]   ;;  %v1081_v6 = vld [vmem:[#allocation7 + $0x1a0] sm:$0xff]  ;;  %v383_v8 = vld [vmem:[#allocation7 + $0xb0] sm:$0xff] }
  0xb3   : > { %v2091_v4 = vld [vmem:[#allocation5 + $0xc8] sm:$0xff]   ;;  %v2092_v9 = vld [vmem:[#allocation5 + $0x50] sm:$0xff]   ;;  %v1084_v11 = vld [vmem:[#allocation7 + $0x1b8] sm:$0xff] }
  0xb4   : > { %1120 = vperm.xlu1 %2070, %v1066_v20   ;;  %1115 = vperm.xlu0 %2069, %v1065_v21   ;;  %v1082_v5 = vld [vmem:[#allocation7 + $0x1a8] sm:$0xff]  ;;  %v2093_v10 = vld [vmem:[#allocation5 + $0xd0] sm:$0xff]   ;;  %v385_v14 = vld [vmem:[#allocation7 + $0xc0] sm:$0xff] }
  0xb5   : > { %v1083_v12 = vld [vmem:[#allocation7 + $0x1b0] sm:$0xff]  ;;  %v386_v13 = vld [vmem:[#allocation7 + $0xc8] sm:$0xff]  ;;  %v2094_v15 = vld [vmem:[#allocation5 + $0x58] sm:$0xff]  }
  0xb6   : > { %v2095_v16 = vld [vmem:[#allocation5 + $0xd8] sm:$0xff]   ;;  %v1086_v17 = vld [vmem:[#allocation7 + $0x1c8] sm:$0xff]  ;;  %v1085_v18 = vld [vmem:[#allocation7 + $0x1c0] sm:$0xff] }
  0xb7   : > { %v388_v19 = vld [vmem:[#allocation7 + $0xd8] sm:$0xff]  ;;  %v387_v20 = vld [vmem:[#allocation7 + $0xd0] sm:$0xff]  ;;  %v2096_v21 = vld [vmem:[#allocation5 + $0x60] sm:$0xff]  }
  0xb8   : > { %430 = vperm.xlu1 %2070, %v368_v22   ;;  %425 = vperm.xlu0 %2069, %v367_v23   ;;  %v2097_v22 = vld [vmem:[#allocation5 + $0xe0] sm:$0xff]   ;;  %v1088_v23 = vld [vmem:[#allocation7 + $0x1d8] sm:$0xff] }
  0xb9   : > { %1899 = vmatmul.mubr.msk.bf16.gmra.mrb[8].mxu0 %vm633_vm1, %v2076_v24  ;;  %1934 = vmatmul.mubr.msk.bf16.gmra.mrb[8].mxu1 %vm633_vm1, %v2077_v25  ;;  %v1087_v24 = vld [vmem:[#allocation7 + $0x1d0] sm:$0xff]  ;;  %v390_v25 = vld [vmem:[#allocation7 + $0xe8] sm:$0xff] }
  0xba   : > { %751 = vmatprep.mubr.bf16.mxu0 %v2353_v0  ;;  %1443 = vmatprep.mubr.bf16.mxu1 %v2353_v0 }
  0xbc   : > { %1130 = vperm.xlu1 %2070, %v1068_v26   ;;  %1125 = vperm.xlu0 %2069, %v1067_v27   ;;  %v389_v26 = vld [vmem:[#allocation7 + $0xe0] sm:$0xff]  ;;  %v2098_v27 = vld [vmem:[#allocation5 + $0x68] sm:$0xff]  }
  0xc0   : > { %440 = vperm.xlu1 %2070, %v370_v28   ;;  %435 = vperm.xlu0 %2069, %v369_v29   ;;  %v2099_v28 = vld [vmem:[#allocation5 + $0xe8] sm:$0xff]  }
  0xc1   : > { %1900 = vmatmul.mubr.msk.bf16.gmra.mrb[12].mxu0 %vm633_vm1, %v2078_v30  ;;  %1935 = vmatmul.mubr.msk.bf16.gmra.mrb[12].mxu1 %vm633_vm1, %v2079_v31  ;;  %v1090_v29 = vld [vmem:[#allocation7 + $0x1e8] sm:$0xff]  ;;  %v1089_v30 = vld [vmem:[#allocation7 + $0x1e0] sm:$0xff]  ;;  %v392_v31 = vld [vmem:[#allocation7 + $0xf8] sm:$0xff] }
  0xc2   : > { %761 = vmatprep.mubr.bf16.mxu0 %v2353_v0  ;;  %1453 = vmatprep.mubr.bf16.mxu1 %v2353_v0 }
  0xc4   : > { %1140 = vperm.xlu1 %2070, %v1070_v32   ;;  %1135 = vperm.xlu0 %2069, %v1069_v33   ;;  %v391_v32 = vld [vmem:[#allocation7 + $0xf0] sm:$0xff] }
  0xc5   : > { %v2100_v33 = vld [vmem:[#allocation5 + $0x70] sm:$0xff]  }
  0xc8   : > { %450 = vperm.xlu1 %2070, %v372_v34   ;;  %445 = vperm.xlu0 %2069, %v371_v35   ;;  %v2101_v34 = vld [vmem:[#allocation5 + $0xf0] sm:$0xff]   ;;  %v1092_v35 = vld [vmem:[#allocation7 + $0x1f8] sm:$0xff] }
  0xc9   : > { %1901 = vmatmul.mubr.msk.bf16.gmra.mrb[16].mxu0 %vm633_vm1, %v2080_v36  ;;  %1936 = vmatmul.mubr.msk.bf16.gmra.mrb[16].mxu1 %vm633_vm1, %v2081_v37  ;;  %v1091_v36 = vld [vmem:[#allocation7 + $0x1f0] sm:$0xff] }
  0xca   : > { %771 = vmatprep.mubr.bf16.mxu0 %v2353_v0  ;;  %1463 = vmatprep.mubr.bf16.mxu1 %v2353_v0  ;;  %v322_v37 = vld [vmem:[#allocation10] sm:$0xff] }
  0xcc   : > { %1150 = vperm.xlu1 %2070, %v1072_v38   ;;  %1145 = vperm.xlu0 %2069, %v1071_v39   ;;  %v2102_v38 = vld [vmem:[#allocation5 + $0x78] sm:$0xff]  }
  0xcd   : > { %v2103_v39 = vld [vmem:[#allocation5 + $0xf8] sm:$0xff]  }
  0xd0   : > { %460 = vperm.xlu1 %2070, %v374_v40   ;;  %455 = vperm.xlu0 %2069, %v373_v41  }
  0xd1   : > { %1902 = vmatmul.mubr.msk.bf16.gmra.mrb[20].mxu0 %vm633_vm1, %v2082_v42  ;;  %1937 = vmatmul.mubr.msk.bf16.gmra.mrb[20].mxu1 %vm633_vm1, %v2083_v43 }
  0xd2   : > { %781 = vmatprep.mubr.bf16.mxu0 %v2353_v0  ;;  %1473 = vmatprep.mubr.bf16.mxu1 %v2353_v0 }
  0xd4   : > { %1160 = vperm.xlu1 %2070, %v1074_v44   ;;  %1155 = vperm.xlu0 %2069, %v1073_v45  }
  0xd8   : > { %470 = vperm.xlu1 %2070, %v376_v46   ;;  %465 = vperm.xlu0 %2069, %v375_v47  }
  0xd9   : > { %1903 = vmatmul.mubr.msk.bf16.gmra.mrb[24].mxu0 %vm633_vm1, %v2084_v48  ;;  %1938 = vmatmul.mubr.msk.bf16.gmra.mrb[24].mxu1 %vm633_vm1, %v2085_v49 }
  0xda   : > { %791 = vmatprep.mubr.bf16.mxu0 %v2353_v0  ;;  %1483 = vmatprep.mubr.bf16.mxu1 %v2353_v0 }
  0xdc   : > { %1170 = vperm.xlu1 %2070, %v1076_v50   ;;  %1165 = vperm.xlu0 %2069, %v1075_v51  }
  0xe0   : > { %480 = vperm.xlu1 %2070, %v378_v52   ;;  %475 = vperm.xlu0 %2069, %v377_v53  }
  0xe1   : > { %1904 = vmatmul.mubr.msk.bf16.gmra.mrb[28].mxu0 %vm633_vm1, %v2086_v54  ;;  %1939 = vmatmul.mubr.msk.bf16.gmra.mrb[28].mxu1 %vm633_vm1, %v2087_v55 }
  0xe2   : > { %801 = vmatprep.mubr.bf16.mxu0 %v2353_v0  ;;  %1493 = vmatprep.mubr.bf16.mxu1 %v2353_v0 }
  0xe4   : > { %1180 = vperm.xlu1 %2070, %v1078_v56   ;;  %1175 = vperm.xlu0 %2069, %v1077_v57  }
  0xe8   : > { %490 = vperm.xlu1 %2070, %v380_v58   ;;  %485 = vperm.xlu0 %2069, %v379_v59  }
  0xe9   : > { %1905 = vmatmul.mubr.msk.bf16.gmra.mrb[32].mxu0 %vm633_vm1, %v2088_v60  ;;  %1940 = vmatmul.mubr.msk.bf16.gmra.mrb[32].mxu1 %vm633_vm1, %v2089_v61 }
  0xea   : > { %811 = vmatprep.mubr.bf16.mxu0 %v2353_v0  ;;  %1503 = vmatprep.mubr.bf16.mxu1 %v2353_v0 }
  0xec   : > { %1190 = vperm.xlu1 %2070, %v1080_v62   ;;  %1185 = vperm.xlu0 %2069, %v1079_v63  }
  0xf0   : > { %500 = vperm.xlu1 %2070, %v382_v1   ;;  %495 = vperm.xlu0 %2069, %v381_v2  }
  0xf1   : > { %1906 = vmatmul.mubr.msk.bf16.gmra.mrb[36].mxu0 %vm633_vm1, %v2090_v3  ;;  %1941 = vmatmul.mubr.msk.bf16.gmra.mrb[36].mxu1 %vm633_vm1, %v2091_v4 }
  0xf2   : > { %821 = vmatprep.mubr.bf16.mxu0 %v2353_v0  ;;  %1513 = vmatprep.mubr.bf16.mxu1 %v2353_v0 }
  0xf4   : > { %1200 = vperm.xlu1 %2070, %v1082_v5   ;;  %1195 = vperm.xlu0 %2069, %v1081_v6  }
  0xf8   : > { %510 = vperm.xlu1 %2070, %v384_v7   ;;  %505 = vperm.xlu0 %2069, %v383_v8  }
  0xf9   : > { %1907 = vmatmul.mubr.msk.bf16.gmra.mrb[40].mxu0 %vm633_vm1, %v2092_v9  ;;  %1942 = vmatmul.mubr.msk.bf16.gmra.mrb[40].mxu1 %vm633_vm1, %v2093_v10 }
  0xfa   : > { %831 = vmatprep.mubr.bf16.mxu0 %v2353_v0  ;;  %1523 = vmatprep.mubr.bf16.mxu1 %v2353_v0 }
  0xfc   : > { %1210 = vperm.xlu1 %2070, %v1084_v11   ;;  %1205 = vperm.xlu0 %2069, %v1083_v12  }
 0x100   : > { %520 = vperm.xlu1 %2070, %v386_v13   ;;  %515 = vperm.xlu0 %2069, %v385_v14  }
 0x101   : > { %1908 = vmatmul.mubr.msk.bf16.gmra.mrb[44].mxu0 %vm633_vm1, %v2094_v15  ;;  %1943 = vmatmul.mubr.msk.bf16.gmra.mrb[44].mxu1 %vm633_vm1, %v2095_v16 }
 0x102   : > { %841 = vmatprep.mubr.bf16.mxu0 %v2353_v0  ;;  %1533 = vmatprep.mubr.bf16.mxu1 %v2353_v0 }
 0x104   : > { %1220 = vperm.xlu1 %2070, %v1086_v17   ;;  %1215 = vperm.xlu0 %2069, %v1085_v18  }
 0x108   : > { %530 = vperm.xlu1 %2070, %v388_v19   ;;  %525 = vperm.xlu0 %2069, %v387_v20  }
 0x109   : > { %1909 = vmatmul.mubr.msk.bf16.gmra.mrb[48].mxu0 %vm633_vm1, %v2096_v21  ;;  %1944 = vmatmul.mubr.msk.bf16.gmra.mrb[48].mxu1 %vm633_vm1, %v2097_v22 }
 0x10a   : > { %851 = vmatprep.mubr.bf16.mxu0 %v2353_v0  ;;  %1543 = vmatprep.mubr.bf16.mxu1 %v2353_v0 }
 0x10c   : > { %1230 = vperm.xlu1 %2070, %v1088_v23   ;;  %1225 = vperm.xlu0 %2069, %v1087_v24  }
 0x110   : > { %540 = vperm.xlu1 %2070, %v390_v25   ;;  %535 = vperm.xlu0 %2069, %v389_v26   ;;  %v946_v25 = vld [vmem:[#allocation8] sm:$0xff]  ;;  %v1638_v26 = vld [vmem:[#allocation8 + $0x8] sm:$0xff] }
 0x111   : > { %1910 = vmatmul.mubr.msk.bf16.gmra.mrb[52].mxu0 %vm633_vm1, %v2098_v27  ;;  %1945 = vmatmul.mubr.msk.bf16.gmra.mrb[52].mxu1 %vm633_vm1, %v2099_v28 }
 0x112   : > { %861 = vmatprep.mubr.bf16.mxu0 %v2353_v0  ;;  %1553 = vmatprep.mubr.bf16.mxu1 %v2353_v0 }
 0x114   : > { %1240 = vperm.xlu1 %2070, %v1090_v29   ;;  %1235 = vperm.xlu0 %2069, %v1089_v30  }
 0x118   : > { %550 = vperm.xlu1 %2070, %v392_v31   ;;  %545 = vperm.xlu0 %2069, %v391_v32  }
 0x119   : > { %1911 = vmatmul.mubr.msk.bf16.gmra.mrb[56].mxu0 %vm633_vm1, %v2100_v33  ;;  %1946 = vmatmul.mubr.msk.bf16.gmra.mrb[56].mxu1 %vm633_vm1, %v2101_v34  ;;  %v1914_v33 = vcombine.high %v946_v25, %v946_v25 }
 0x11a   : > { %871 = vmatprep.mubr.bf16.mxu0 %v2353_v0  ;;  %1563 = vmatprep.mubr.bf16.mxu1 %v2353_v0 }
 0x11c   : > { %1250 = vperm.xlu1 %2070, %v1092_v35   ;;  %1245 = vperm.xlu0 %2069, %v1091_v36  }
 0x11f   : > { %v1096_v40 = vpop.permute.xlu1 %1095  ;;  %v396_v41 = vpop.permute.xlu0 %395 }
 0x120   : > { %325 = vperm.xlu0 %2069, %v322_v37   ;;  %v1949_v37 = vcombine.high %v1638_v26, %v1638_v26 }
 0x121   : > { %1912 = vmatmul.mubr.msk.bf16.gmra.mrb[60].mxu0 %vm633_vm1, %v2102_v38  ;;  %1947 = vmatmul.mubr.msk.bf16.gmra.mrb[60].mxu1 %vm633_vm1, %v2103_v39 }
 0x122   : > { %1018 = vmatprep.mubr.bf16.mxu0 %v1914_v33  ;;  %1710 = vmatprep.mubr.bf16.mxu1 %v1949_v37 }
 0x123   : > { %v1101_v42 = vpop.permute.xlu1 %1100  ;;  %v401_v43 = vpop.permute.xlu0 %400 }
 0x127   : > { %v2693_v44 = vpop.permute.xlu1 %410  ;;  %v2695_v45 = vpop.permute.xlu0 %405 }
 0x12b   : > { %v2697_v46 = vpop.permute.xlu1 %1110  ;;  %v2699_v0 = vpop.permute.xlu0 %1105 }
 0x12f   : > { %v2701_v47 = vpop.permute.xlu1 %420  ;;  %v2703_v48 = vpop.permute.xlu0 %415 }
 0x133   : > { %v2705_v49 = vpop.permute.xlu1 %1120  ;;  %v2707_v50 = vpop.permute.xlu0 %1115 }
 0x137   : > { %v2709_v51 = vpop.permute.xlu1 %430  ;;  %v2711_v52 = vpop.permute.xlu0 %425 }
 0x13b   : > { %v2713_v53 = vpop.permute.xlu1 %1130  ;;  %v2715_v54 = vpop.permute.xlu0 %1125 }
 0x13f   : > { %v2717_v55 = vpop.permute.xlu1 %440  ;;  %v2719_v56 = vpop.permute.xlu0 %435 }
 0x143   : > { %v2721_v57 = vpop.permute.xlu1 %1140  ;;  %v2723_v58 = vpop.permute.xlu0 %1135 }
 0x147   : > { %v2725_v59 = vpop.permute.xlu1 %450  ;;  %v2727_v60 = vpop.permute.xlu0 %445 }
 0x14b   : > { %v2729_v61 = vpop.permute.xlu1 %1150  ;;  %v2731_v62 = vpop.permute.xlu0 %1145 }
 0x14f   : > { %v2733_v63 = vpop.permute.xlu1 %460  ;;  %v2735_v1 = vpop.permute.xlu0 %455 }
 0x153   : > { %v2737_v2 = vpop.permute.xlu1 %1160  ;;  %v2739_v3 = vpop.permute.xlu0 %1155 }
 0x157   : > { %v2741_v4 = vpop.permute.xlu1 %470  ;;  %v2743_v5 = vpop.permute.xlu0 %465 }
 0x15b   : > { %v2745_v6 = vpop.permute.xlu1 %1170  ;;  %v2747_v7 = vpop.permute.xlu0 %1165 }
 0x15f   : > { %v2749_v8 = vpop.permute.xlu1 %480  ;;  %v2751_v9 = vpop.permute.xlu0 %475 }
 0x17c   : > { %v723_v10 = vpop.f32.mrb[0].mxu0  ;;  %v1415_v11 = vpop.f32.mrb[0].mxu1 }
 0x17d   : > { %v724_v12 = vadd.f32 %v723_v10, %v396_v41  ;;  %v1416_v13 = vadd.f32 %v1415_v11, %v1096_v40  ;;  %v725_v14 = vpop.f32.mrb[1].mxu0  ;;  %v1417_v15 = vpop.f32.mrb[1].mxu1 }
 0x17e   : > { %v726_v16 = vadd.f32 %v725_v14, %v396_v41  ;;  %v1418_v17 = vadd.f32 %v1417_v15, %v1096_v40  ;;  %v727_v18 = vpop.f32.mrb[2].mxu0  ;;  %v1419_v19 = vpop.f32.mrb[2].mxu1 }
 0x17f   : > { %v1574_v20 = vmax.f32 %v1416_v13, 0.0  ;;  %v728_v21 = vadd.f32 %v727_v18, %v401_v43  ;;  %v1420_v22 = vadd.f32 %v1419_v19, %v1101_v42  ;;  %v729_v23 = vpop.f32.mrb[3].mxu0  ;;  %v1421_v24 = vpop.f32.mrb[3].mxu1  ;;  %v882_v27 = vmax.f32 %v724_v12, 0.0 }
 0x180   : > { %v730_v28 = vadd.f32 %v729_v23, %v401_v43  ;;  %v1422_v29 = vadd.f32 %v1421_v24, %v1101_v42  ;;  %v883_v30 = vmax.f32 %v726_v16, 0.0  ;;  %v1575_v34 = vmax.f32 %v1418_v17, 0.0  ;;  %v2753_v40 = vpop.permute.xlu1 %1180  ;;  %v2755_v41 = vpop.permute.xlu0 %1175 }
 0x181   : > { %v884_v31 = vmax.f32 %v728_v21, 0.0  ;;  %v1576_v32 = vmax.f32 %v1420_v22, 0.0 }
 0x182   : > { %v885_v35 = vmax.f32 %v730_v28, 0.0  ;;  %v1577_v36 = vmax.f32 %v1422_v29, 0.0 }
 0x183   : > { %v947_v38 = vpack.c.bf16 %v884_v31, %v882_v27  ;;  %v1639_v39 = vpack.c.bf16 %v1576_v32, %v1574_v20 }
 0x184   : > { %v948_v10 = vpack.c.bf16 %v885_v35, %v883_v30  ;;  %v1640_v11 = vpack.c.bf16 %v1577_v36, %v1575_v34  ;;  %v733_v43 = vpop.f32.mrb[4].mxu0  ;;  %v1425_v42 = vpop.f32.mrb[4].mxu1 }
 0x185   : > { %v734_v12 = vadd.f32 %v733_v43, %v2695_v45  ;;  %v1426_v13 = vadd.f32 %v1425_v42, %v2699_v0  ;;  %v735_v14 = vpop.f32.mrb[5].mxu0  ;;  %v1427_v15 = vpop.f32.mrb[5].mxu1 }
 0x186   : > { %986 = vmatprep.subr.bf16.mxu0 %v948_v10  ;;  %1678 = vmatprep.subr.bf16.mxu1 %v1640_v11  ;;  %v736_v16 = vadd.f32 %v735_v14, %v2695_v45  ;;  %v1428_v17 = vadd.f32 %v1427_v15, %v2699_v0  ;;  %v737_v18 = vpop.f32.mrb[6].mxu0  ;;  %v1429_v19 = vpop.f32.mrb[6].mxu1 }
 0x187   : > { %987 = vmatpush1.bf16.msra.mxu0 %v947_v38  ;;  %1679 = vmatpush1.bf16.msra.mxu1 %v1639_v39  ;;  %v738_v20 = vadd.f32 %v737_v18, %v2693_v44  ;;  %v1430_v21 = vadd.f32 %v1429_v19, %v2697_v46  ;;  %v739_v22 = vpop.f32.mrb[7].mxu0  ;;  %v1431_v23 = vpop.f32.mrb[7].mxu1  ;;  %v886_v26 = vmax.f32 %v734_v12, 0.0  ;;  %v1578_v27 = vmax.f32 %v1426_v13, 0.0 }
 0x188   : > { %v740_v24 = vadd.f32 %v739_v22, %v2693_v44  ;;  %v1432_v25 = vadd.f32 %v1431_v23, %v2697_v46  ;;  %v887_v29 = vmax.f32 %v736_v16, 0.0  ;;  %v1579_v0 = vmax.f32 %v1428_v17, 0.0  ;;  %v2765_v36 = vpop.permute.xlu1 %490  ;;  %v2767_v37 = vpop.permute.xlu0 %485 }
 0x189   : > { %v888_v28 = vmax.f32 %v738_v20, 0.0  ;;  %v1580_v45 = vmax.f32 %v1430_v21, 0.0 }
 0x18a   : > { %v889_v30 = vmax.f32 %v740_v24, 0.0  ;;  %v1581_v31 = vmax.f32 %v1432_v25, 0.0 }
 0x18b   : > { %v949_v32 = vpack.c.bf16 %v888_v28, %v886_v26  ;;  %v1641_v33 = vpack.c.bf16 %v1580_v45, %v1578_v27 }
 0x18c   : > { %v743_v34 = vpop.f32.mrb[8].mxu0  ;;  %v1435_v35 = vpop.f32.mrb[8].mxu1  ;;  %v950_v38 = vpack.c.bf16 %v889_v30, %v887_v29  ;;  %v1642_v44 = vpack.c.bf16 %v1581_v31, %v1579_v0 }
 0x18d   : > { %v744_v46 = vadd.f32 %v743_v34, %v2703_v48  ;;  %v1436_v39 = vadd.f32 %v1435_v35, %v2707_v50  ;;  %v745_v10 = vpop.f32.mrb[9].mxu0  ;;  %v1437_v11 = vpop.f32.mrb[9].mxu1 }
 0x18e   : > { %v746_v43 = vadd.f32 %v745_v10, %v2703_v48  ;;  %v1438_v42 = vadd.f32 %v1437_v11, %v2707_v50  ;;  %v747_v12 = vpop.f32.mrb[10].mxu0  ;;  %988 = vmatprep.subr.bf16.mxu0 %v950_v38  ;;  %v1439_v13 = vpop.f32.mrb[10].mxu1  ;;  %1680 = vmatprep.subr.bf16.mxu1 %v1642_v44 }
 0x18f   : > { %v748_v14 = vadd.f32 %v747_v12, %v2701_v47  ;;  %v1440_v15 = vadd.f32 %v1439_v13, %v2705_v49  ;;  %v749_v16 = vpop.f32.mrb[11].mxu0  ;;  %989 = vmatpush1.bf16.msra.mxu0 %v949_v32  ;;  %v1441_v17 = vpop.f32.mrb[11].mxu1  ;;  %1681 = vmatpush1.bf16.msra.mxu1 %v1641_v33  ;;  %v890_v20 = vmax.f32 %v744_v46, 0.0  ;;  %v1582_v48 = vmax.f32 %v1436_v39, 0.0 }
 0x190   : > { %v750_v18 = vadd.f32 %v749_v16, %v2701_v47  ;;  %v1442_v19 = vadd.f32 %v1441_v17, %v2705_v49  ;;  %v891_v22 = vmax.f32 %v746_v43, 0.0  ;;  %v1583_v23 = vmax.f32 %v1438_v42, 0.0  ;;  %v2777_v29 = vpop.permute.xlu1 %1190  ;;  %v2779_v0 = vpop.permute.xlu0 %1185 }
 0x191   : > { %v892_v21 = vmax.f32 %v748_v14, 0.0  ;;  %v1584_v50 = vmax.f32 %v1440_v15, 0.0 }
 0x192   : > { %v893_v24 = vmax.f32 %v750_v18, 0.0  ;;  %v1585_v25 = vmax.f32 %v1442_v19, 0.0 }
 0x193   : > { %v951_v26 = vpack.c.bf16 %v892_v21, %v890_v20  ;;  %v1643_v27 = vpack.c.bf16 %v1584_v50, %v1582_v48 }
 0x194   : > { %v753_v28 = vpop.f32.mrb[12].mxu0  ;;  %v1445_v45 = vpop.f32.mrb[12].mxu1  ;;  %v952_v30 = vpack.c.bf16 %v893_v24, %v891_v22  ;;  %v1644_v47 = vpack.c.bf16 %v1585_v25, %v1583_v23 }
 0x195   : > { %v754_v49 = vadd.f32 %v753_v28, %v2711_v52  ;;  %v1446_v31 = vadd.f32 %v1445_v45, %v2715_v54  ;;  %v755_v32 = vpop.f32.mrb[13].mxu0  ;;  %v1447_v33 = vpop.f32.mrb[13].mxu1 }
 0x196   : > { %v756_v34 = vadd.f32 %v755_v32, %v2711_v52  ;;  %v1448_v35 = vadd.f32 %v1447_v33, %v2715_v54  ;;  %v757_v38 = vpop.f32.mrb[14].mxu0  ;;  %990 = vmatprep.subr.bf16.mxu0 %v952_v30  ;;  %v1449_v44 = vpop.f32.mrb[14].mxu1  ;;  %1682 = vmatprep.subr.bf16.mxu1 %v1644_v47 }
 0x197   : > { %v758_v46 = vadd.f32 %v757_v38, %v2709_v51  ;;  %v1450_v39 = vadd.f32 %v1449_v44, %v2713_v53  ;;  %v759_v10 = vpop.f32.mrb[15].mxu0  ;;  %991 = vmatpush1.bf16.msra.mxu0 %v951_v26  ;;  %v1451_v11 = vpop.f32.mrb[15].mxu1  ;;  %1683 = vmatpush1.bf16.msra.mxu1 %v1643_v27  ;;  %v894_v12 = vmax.f32 %v754_v49, 0.0  ;;  %v1586_v52 = vmax.f32 %v1446_v31, 0.0 }
 0x198   : > { %v760_v43 = vadd.f32 %v759_v10, %v2709_v51  ;;  %v1452_v42 = vadd.f32 %v1451_v11, %v2713_v53  ;;  %v895_v14 = vmax.f32 %v756_v34, 0.0  ;;  %v1587_v15 = vmax.f32 %v1448_v35, 0.0  ;;  %v2789_v21 = vpop.permute.xlu1 %500  ;;  %v2791_v50 = vpop.permute.xlu0 %495 }
 0x199   : > { %v896_v13 = vmax.f32 %v758_v46, 0.0  ;;  %v1588_v54 = vmax.f32 %v1450_v39, 0.0 }
 0x19a   : > { %v897_v16 = vmax.f32 %v760_v43, 0.0  ;;  %v1589_v17 = vmax.f32 %v1452_v42, 0.0 }
 0x19b   : > { %v953_v18 = vpack.c.bf16 %v896_v13, %v894_v12  ;;  %v1645_v19 = vpack.c.bf16 %v1588_v54, %v1586_v52 }
 0x19c   : > { %v763_v20 = vpop.f32.mrb[16].mxu0  ;;  %v1455_v48 = vpop.f32.mrb[16].mxu1  ;;  %v954_v22 = vpack.c.bf16 %v897_v16, %v895_v14  ;;  %v1646_v51 = vpack.c.bf16 %v1589_v17, %v1587_v15 }
 0x19d   : > { %v764_v53 = vadd.f32 %v763_v20, %v2719_v56  ;;  %v1456_v23 = vadd.f32 %v1455_v48, %v2723_v58  ;;  %v765_v24 = vpop.f32.mrb[17].mxu0  ;;  %v1457_v25 = vpop.f32.mrb[17].mxu1 }
 0x19e   : > { %v766_v26 = vadd.f32 %v765_v24, %v2719_v56  ;;  %v1458_v27 = vadd.f32 %v1457_v25, %v2723_v58  ;;  %v767_v28 = vpop.f32.mrb[18].mxu0  ;;  %992 = vmatprep.subr.bf16.mxu0 %v954_v22  ;;  %v1459_v45 = vpop.f32.mrb[18].mxu1  ;;  %1684 = vmatprep.subr.bf16.mxu1 %v1646_v51 }
 0x19f   : > { %v768_v30 = vadd.f32 %v767_v28, %v2717_v55  ;;  %v1460_v47 = vadd.f32 %v1459_v45, %v2721_v57  ;;  %v769_v49 = vpop.f32.mrb[19].mxu0  ;;  %993 = vmatpush1.bf16.msra.mxu0 %v953_v18  ;;  %v1461_v31 = vpop.f32.mrb[19].mxu1  ;;  %1685 = vmatpush1.bf16.msra.mxu1 %v1645_v19  ;;  %v898_v34 = vmax.f32 %v764_v53, 0.0  ;;  %v1590_v56 = vmax.f32 %v1456_v23, 0.0 }
 0x1a0   : > { %v770_v32 = vadd.f32 %v769_v49, %v2717_v55  ;;  %v1462_v33 = vadd.f32 %v1461_v31, %v2721_v57  ;;  %v2801_v38 = vpop.permute.xlu1 %1200  ;;  %v2803_v44 = vpop.permute.xlu0 %1195  ;;  %v899_v46 = vmax.f32 %v766_v26, 0.0  ;;  %v1591_v39 = vmax.f32 %v1458_v27, 0.0 }
 0x1a1   : > { %v900_v35 = vmax.f32 %v768_v30, 0.0  ;;  %v1592_v58 = vmax.f32 %v1460_v47, 0.0 }
 0x1a2   : > { %v901_v10 = vmax.f32 %v770_v32, 0.0  ;;  %v1593_v11 = vmax.f32 %v1462_v33, 0.0 }
 0x1a3   : > { %v955_v43 = vpack.c.bf16 %v900_v35, %v898_v34  ;;  %v1647_v42 = vpack.c.bf16 %v1592_v58, %v1590_v56 }
 0x1a4   : > { %v773_v12 = vpop.f32.mrb[20].mxu0  ;;  %v1465_v52 = vpop.f32.mrb[20].mxu1  ;;  %v956_v13 = vpack.c.bf16 %v901_v10, %v899_v46  ;;  %v1648_v55 = vpack.c.bf16 %v1593_v11, %v1591_v39 }
 0x1a5   : > { %v774_v57 = vadd.f32 %v773_v12, %v2727_v60  ;;  %v1466_v54 = vadd.f32 %v1465_v52, %v2731_v62  ;;  %v775_v14 = vpop.f32.mrb[21].mxu0  ;;  %v1467_v15 = vpop.f32.mrb[21].mxu1 }
 0x1a6   : > { %v776_v16 = vadd.f32 %v775_v14, %v2727_v60  ;;  %v1468_v17 = vadd.f32 %v1467_v15, %v2731_v62  ;;  %v777_v18 = vpop.f32.mrb[22].mxu0  ;;  %v1469_v19 = vpop.f32.mrb[22].mxu1  ;;  %994 = vmatprep.subr.bf16.mxu0 %v956_v13  ;;  %1686 = vmatprep.subr.bf16.mxu1 %v1648_v55 }
 0x1a7   : > { %v778_v20 = vadd.f32 %v777_v18, %v2725_v59  ;;  %v1470_v48 = vadd.f32 %v1469_v19, %v2729_v61  ;;  %v779_v22 = vpop.f32.mrb[23].mxu0  ;;  %v1471_v51 = vpop.f32.mrb[23].mxu1  ;;  %995 = vmatpush1.bf16.msra.mxu0 %v955_v43  ;;  %1687 = vmatpush1.bf16.msra.mxu1 %v1647_v42  ;;  %v902_v24 = vmax.f32 %v774_v57, 0.0  ;;  %v1594_v60 = vmax.f32 %v1466_v54, 0.0 }
 0x1a8   : > { %v780_v53 = vadd.f32 %v779_v22, %v2725_v59  ;;  %v1472_v23 = vadd.f32 %v1471_v51, %v2729_v61  ;;  %v903_v26 = vmax.f32 %v776_v16, 0.0  ;;  %v1595_v27 = vmax.f32 %v1468_v17, 0.0  ;;  %v2813_v30 = vpop.permute.xlu1 %510  ;;  %v2815_v47 = vpop.permute.xlu0 %505 }
 0x1a9   : > { %v904_v25 = vmax.f32 %v778_v20, 0.0  ;;  %v1596_v62 = vmax.f32 %v1470_v48, 0.0 }
 0x1aa   : > { %v905_v28 = vmax.f32 %v780_v53, 0.0  ;;  %v1597_v45 = vmax.f32 %v1472_v23, 0.0 }
 0x1ab   : > { %v957_v49 = vpack.c.bf16 %v904_v25, %v902_v24  ;;  %v1649_v31 = vpack.c.bf16 %v1596_v62, %v1594_v60 }
 0x1ac   : > { %v958_v32 = vpack.c.bf16 %v905_v28, %v903_v26  ;;  %v1650_v59 = vpack.c.bf16 %v1597_v45, %v1595_v27  ;;  %v783_v33 = vpop.f32.mrb[24].mxu0  ;;  %v1475_v34 = vpop.f32.mrb[24].mxu1 }
 0x1ad   : > { %v784_v61 = vadd.f32 %v783_v33, %v2735_v1  ;;  %v1476_v56 = vadd.f32 %v1475_v34, %v2739_v3  ;;  %v785_v35 = vpop.f32.mrb[25].mxu0  ;;  %v1477_v58 = vpop.f32.mrb[25].mxu1 }
 0x1ae   : > { %v786_v46 = vadd.f32 %v785_v35, %v2735_v1  ;;  %v1478_v39 = vadd.f32 %v1477_v58, %v2739_v3  ;;  %v787_v10 = vpop.f32.mrb[26].mxu0  ;;  %996 = vmatprep.subr.bf16.mxu0 %v958_v32  ;;  %v1479_v11 = vpop.f32.mrb[26].mxu1  ;;  %1688 = vmatprep.subr.bf16.mxu1 %v1650_v59 }
 0x1af   : > { %v788_v43 = vadd.f32 %v787_v10, %v2733_v63  ;;  %v1480_v42 = vadd.f32 %v1479_v11, %v2737_v2  ;;  %v789_v12 = vpop.f32.mrb[27].mxu0  ;;  %997 = vmatpush1.bf16.msra.mxu0 %v957_v49  ;;  %v1481_v52 = vpop.f32.mrb[27].mxu1  ;;  %1689 = vmatpush1.bf16.msra.mxu1 %v1649_v31  ;;  %v906_v57 = vmax.f32 %v784_v61, 0.0  ;;  %v1598_v1 = vmax.f32 %v1476_v56, 0.0 }
 0x1b0   : > { %v790_v13 = vadd.f32 %v789_v12, %v2733_v63  ;;  %v1482_v55 = vadd.f32 %v1481_v52, %v2737_v2  ;;  %v907_v14 = vmax.f32 %v786_v46, 0.0  ;;  %v1599_v15 = vmax.f32 %v1478_v39, 0.0  ;;  %v2825_v18 = vpop.permute.xlu1 %1210  ;;  %v2827_v19 = vpop.permute.xlu0 %1205 }
 0x1b1   : > { %v908_v54 = vmax.f32 %v788_v43, 0.0  ;;  %v1600_v3 = vmax.f32 %v1480_v42, 0.0 }
 0x1b2   : > { %v909_v16 = vmax.f32 %v790_v13, 0.0  ;;  %v1601_v17 = vmax.f32 %v1482_v55, 0.0 }
 0x1b3   : > { %v959_v20 = vpack.c.bf16 %v908_v54, %v906_v57  ;;  %v1651_v48 = vpack.c.bf16 %v1600_v3, %v1598_v1 }
 0x1b4   : > { %v960_v22 = vpack.c.bf16 %v909_v16, %v907_v14  ;;  %v1652_v51 = vpack.c.bf16 %v1601_v17, %v1599_v15  ;;  %v793_v53 = vpop.f32.mrb[28].mxu0  ;;  %v1485_v63 = vpop.f32.mrb[28].mxu1 }
 0x1b5   : > { %v794_v2 = vadd.f32 %v793_v53, %v2743_v5  ;;  %v1486_v23 = vadd.f32 %v1485_v63, %v2747_v7  ;;  %v795_v24 = vpop.f32.mrb[29].mxu0  ;;  %v1487_v60 = vpop.f32.mrb[29].mxu1 }
 0x1b6   : > { %v796_v25 = vadd.f32 %v795_v24, %v2743_v5  ;;  %v1488_v62 = vadd.f32 %v1487_v60, %v2747_v7  ;;  %v797_v26 = vpop.f32.mrb[30].mxu0  ;;  %998 = vmatprep.subr.bf16.mxu0 %v960_v22  ;;  %v1489_v27 = vpop.f32.mrb[30].mxu1  ;;  %1690 = vmatprep.subr.bf16.mxu1 %v1652_v51 }
 0x1b7   : > { %v798_v28 = vadd.f32 %v797_v26, %v2741_v4  ;;  %v1490_v45 = vadd.f32 %v1489_v27, %v2745_v6  ;;  %v799_v49 = vpop.f32.mrb[31].mxu0  ;;  %999 = vmatpush1.bf16.msra.mxu0 %v959_v20  ;;  %v1491_v31 = vpop.f32.mrb[31].mxu1  ;;  %1691 = vmatpush1.bf16.msra.mxu1 %v1651_v48  ;;  %v910_v33 = vmax.f32 %v794_v2, 0.0  ;;  %v1602_v5 = vmax.f32 %v1486_v23, 0.0 }
 0x1b8   : > { %v800_v32 = vadd.f32 %v799_v49, %v2741_v4  ;;  %v1492_v59 = vadd.f32 %v1491_v31, %v2745_v6  ;;  %v911_v61 = vmax.f32 %v796_v25, 0.0  ;;  %v1603_v56 = vmax.f32 %v1488_v62, 0.0  ;;  %v2837_v46 = vpop.permute.xlu1 %520  ;;  %v2839_v39 = vpop.permute.xlu0 %515 }
 0x1b9   : > { %v912_v34 = vmax.f32 %v798_v28, 0.0  ;;  %v1604_v7 = vmax.f32 %v1490_v45, 0.0 }
 0x1ba   : > { %v913_v35 = vmax.f32 %v800_v32, 0.0  ;;  %v1605_v58 = vmax.f32 %v1492_v59, 0.0 }
 0x1bb   : > { %v961_v10 = vpack.c.bf16 %v912_v34, %v910_v33  ;;  %v1653_v11 = vpack.c.bf16 %v1604_v7, %v1602_v5 }
 0x1bc   : > { %v962_v43 = vpack.c.bf16 %v913_v35, %v911_v61  ;;  %v1654_v42 = vpack.c.bf16 %v1605_v58, %v1603_v56  ;;  %v803_v12 = vpop.f32.mrb[32].mxu0  ;;  %v1495_v4 = vpop.f32.mrb[32].mxu1 }
 0x1bd   : > { %v804_v6 = vadd.f32 %v803_v12, %v2751_v9  ;;  %v1496_v52 = vadd.f32 %v1495_v4, %v2755_v41  ;;  %v805_v13 = vpop.f32.mrb[33].mxu0  ;;  %v1497_v55 = vpop.f32.mrb[33].mxu1 }
 0x1be   : > { %v806_v57 = vadd.f32 %v805_v13, %v2751_v9  ;;  %v1498_v1 = vadd.f32 %v1497_v55, %v2755_v41  ;;  %v807_v54 = vpop.f32.mrb[34].mxu0  ;;  %1000 = vmatprep.subr.bf16.mxu0 %v962_v43  ;;  %v1499_v3 = vpop.f32.mrb[34].mxu1  ;;  %1692 = vmatprep.subr.bf16.mxu1 %v1654_v42 }
 0x1bf   : > { %v808_v14 = vadd.f32 %v807_v54, %v2749_v8  ;;  %v1500_v15 = vadd.f32 %v1499_v3, %v2753_v40  ;;  %v809_v16 = vpop.f32.mrb[35].mxu0  ;;  %1001 = vmatpush1.bf16.msra.mxu0 %v961_v10  ;;  %v1501_v17 = vpop.f32.mrb[35].mxu1  ;;  %1693 = vmatpush1.bf16.msra.mxu1 %v1653_v11  ;;  %v914_v22 = vmax.f32 %v804_v6, 0.0  ;;  %v1606_v9 = vmax.f32 %v1496_v52, 0.0 }
 0x1c0   : > { %v810_v20 = vadd.f32 %v809_v16, %v2749_v8  ;;  %v1502_v48 = vadd.f32 %v1501_v17, %v2753_v40  ;;  %v915_v53 = vmax.f32 %v806_v57, 0.0  ;;  %v1607_v63 = vmax.f32 %v1498_v1, 0.0  ;;  %v2849_v24 = vpop.permute.xlu1 %1220  ;;  %v2851_v60 = vpop.permute.xlu0 %1215 }
 0x1c1   : > { %v916_v51 = vmax.f32 %v808_v14, 0.0  ;;  %v1608_v41 = vmax.f32 %v1500_v15, 0.0 }
 0x1c2   : > { %v917_v2 = vmax.f32 %v810_v20, 0.0  ;;  %v1609_v23 = vmax.f32 %v1502_v48, 0.0 }
 0x1c3   : > { %v963_v25 = vpack.c.bf16 %v916_v51, %v914_v22  ;;  %v1655_v62 = vpack.c.bf16 %v1608_v41, %v1606_v9 }
 0x1c4   : > { %v964_v26 = vpack.c.bf16 %v917_v2, %v915_v53  ;;  %v1656_v27 = vpack.c.bf16 %v1609_v23, %v1607_v63  ;;  %v813_v28 = vpop.f32.mrb[36].mxu0  ;;  %v1505_v8 = vpop.f32.mrb[36].mxu1 }
 0x1c5   : > { %v814_v40 = vadd.f32 %v813_v28, %v2767_v37  ;;  %v1506_v45 = vadd.f32 %v1505_v8, %v2779_v0  ;;  %v815_v49 = vpop.f32.mrb[37].mxu0  ;;  %v1507_v31 = vpop.f32.mrb[37].mxu1 }
 0x1c6   : > { %v816_v32 = vadd.f32 %v815_v49, %v2767_v37  ;;  %v1508_v59 = vadd.f32 %v1507_v31, %v2779_v0  ;;  %v817_v33 = vpop.f32.mrb[38].mxu0  ;;  %1002 = vmatprep.subr.bf16.mxu0 %v964_v26  ;;  %v1509_v5 = vpop.f32.mrb[38].mxu1  ;;  %1694 = vmatprep.subr.bf16.mxu1 %v1656_v27 }
 0x1c7   : > { %v818_v34 = vadd.f32 %v817_v33, %v2765_v36  ;;  %v1510_v7 = vadd.f32 %v1509_v5, %v2777_v29  ;;  %v819_v61 = vpop.f32.mrb[39].mxu0  ;;  %1003 = vmatpush1.bf16.msra.mxu0 %v963_v25  ;;  %v1511_v56 = vpop.f32.mrb[39].mxu1  ;;  %1695 = vmatpush1.bf16.msra.mxu1 %v1655_v62  ;;  %v918_v10 = vmax.f32 %v814_v40, 0.0  ;;  %v1610_v37 = vmax.f32 %v1506_v45, 0.0 }
 0x1c8   : > { %v820_v35 = vadd.f32 %v819_v61, %v2765_v36  ;;  %v1512_v58 = vadd.f32 %v1511_v56, %v2777_v29  ;;  %v919_v43 = vmax.f32 %v816_v32, 0.0  ;;  %v1611_v42 = vmax.f32 %v1508_v59, 0.0  ;;  %v2861_v6 = vpop.permute.xlu1 %530  ;;  %v2863_v52 = vpop.permute.xlu0 %525 }
 0x1c9   : > { %v920_v11 = vmax.f32 %v818_v34, 0.0  ;;  %v1612_v0 = vmax.f32 %v1510_v7, 0.0 }
 0x1ca   : > { %v921_v12 = vmax.f32 %v820_v35, 0.0  ;;  %v1613_v4 = vmax.f32 %v1512_v58, 0.0 }
 0x1cb   : > { %v965_v13 = vpack.c.bf16 %v920_v11, %v918_v10  ;;  %v1657_v55 = vpack.c.bf16 %v1612_v0, %v1610_v37 }
 0x1cc   : > { %v966_v57 = vpack.c.bf16 %v921_v12, %v919_v43  ;;  %v1658_v1 = vpack.c.bf16 %v1613_v4, %v1611_v42  ;;  %v823_v54 = vpop.f32.mrb[40].mxu0  ;;  %v1515_v36 = vpop.f32.mrb[40].mxu1 }
 0x1cd   : > { %v824_v29 = vadd.f32 %v823_v54, %v2791_v50  ;;  %v1516_v3 = vadd.f32 %v1515_v36, %v2803_v44  ;;  %v825_v14 = vpop.f32.mrb[41].mxu0  ;;  %v1517_v15 = vpop.f32.mrb[41].mxu1 }
 0x1ce   : > { %v826_v16 = vadd.f32 %v825_v14, %v2791_v50  ;;  %v1518_v17 = vadd.f32 %v1517_v15, %v2803_v44  ;;  %v827_v20 = vpop.f32.mrb[42].mxu0  ;;  %1004 = vmatprep.subr.bf16.mxu0 %v966_v57  ;;  %v1519_v48 = vpop.f32.mrb[42].mxu1  ;;  %1696 = vmatprep.subr.bf16.mxu1 %v1658_v1 }
 0x1cf   : > { %v828_v22 = vadd.f32 %v827_v20, %v2789_v21  ;;  %v1520_v9 = vadd.f32 %v1519_v48, %v2801_v38  ;;  %v829_v51 = vpop.f32.mrb[43].mxu0  ;;  %1005 = vmatpush1.bf16.msra.mxu0 %v965_v13  ;;  %v1521_v41 = vpop.f32.mrb[43].mxu1  ;;  %1697 = vmatpush1.bf16.msra.mxu1 %v1657_v55  ;;  %v922_v2 = vmax.f32 %v824_v29, 0.0  ;;  %v1614_v50 = vmax.f32 %v1516_v3, 0.0 }
 0x1d0   : > { %v830_v53 = vadd.f32 %v829_v51, %v2789_v21  ;;  %v1522_v63 = vadd.f32 %v1521_v41, %v2801_v38  ;;  %v923_v25 = vmax.f32 %v826_v16, 0.0  ;;  %v1615_v62 = vmax.f32 %v1518_v17, 0.0  ;;  %v2873_v28 = vpop.permute.xlu1 %1230  ;;  %v2875_v8 = vpop.permute.xlu0 %1225 }
 0x1d1   : > { %v924_v23 = vmax.f32 %v828_v22, 0.0  ;;  %v1616_v44 = vmax.f32 %v1520_v9, 0.0 }
 0x1d2   : > { %v925_v26 = vmax.f32 %v830_v53, 0.0  ;;  %v1617_v27 = vmax.f32 %v1522_v63, 0.0 }
 0x1d3   : > { %v967_v40 = vpack.c.bf16 %v924_v23, %v922_v2  ;;  %v1659_v45 = vpack.c.bf16 %v1616_v44, %v1614_v50 }
 0x1d4   : > { %v968_v49 = vpack.c.bf16 %v925_v26, %v923_v25  ;;  %v1660_v31 = vpack.c.bf16 %v1617_v27, %v1615_v62  ;;  %v833_v32 = vpop.f32.mrb[44].mxu0  ;;  %v1525_v21 = vpop.f32.mrb[44].mxu1 }
 0x1d5   : > { %v834_v38 = vadd.f32 %v833_v32, %v2815_v47  ;;  %v1526_v59 = vadd.f32 %v1525_v21, %v2827_v19  ;;  %v835_v33 = vpop.f32.mrb[45].mxu0  ;;  %v1527_v5 = vpop.f32.mrb[45].mxu1 }
 0x1d6   : > { %v836_v34 = vadd.f32 %v835_v33, %v2815_v47  ;;  %v1528_v7 = vadd.f32 %v1527_v5, %v2827_v19  ;;  %v837_v61 = vpop.f32.mrb[46].mxu0  ;;  %1006 = vmatprep.subr.bf16.mxu0 %v968_v49  ;;  %v1529_v56 = vpop.f32.mrb[46].mxu1  ;;  %1698 = vmatprep.subr.bf16.mxu1 %v1660_v31 }
 0x1d7   : > { %v838_v35 = vadd.f32 %v837_v61, %v2813_v30  ;;  %v1530_v58 = vadd.f32 %v1529_v56, %v2825_v18  ;;  %v839_v10 = vpop.f32.mrb[47].mxu0  ;;  %1007 = vmatpush1.bf16.msra.mxu0 %v967_v40  ;;  %v1531_v37 = vpop.f32.mrb[47].mxu1  ;;  %1699 = vmatpush1.bf16.msra.mxu1 %v1659_v45  ;;  %v926_v43 = vmax.f32 %v834_v38, 0.0  ;;  %v1618_v47 = vmax.f32 %v1526_v59, 0.0 }
 0x1d8   : > { %v840_v11 = vadd.f32 %v839_v10, %v2813_v30  ;;  %v1532_v0 = vadd.f32 %v1531_v37, %v2825_v18  ;;  %v927_v12 = vmax.f32 %v836_v34, 0.0  ;;  %v1619_v4 = vmax.f32 %v1528_v7, 0.0  ;;  %v2885_v57 = vpop.permute.xlu1 %540  ;;  %v2887_v1 = vpop.permute.xlu0 %535 }
 0x1d9   : > { %v928_v42 = vmax.f32 %v838_v35, 0.0  ;;  %v1620_v19 = vmax.f32 %v1530_v58, 0.0 }
 0x1da   : > { %v929_v13 = vmax.f32 %v840_v11, 0.0  ;;  %v1621_v55 = vmax.f32 %v1532_v0, 0.0 }
 0x1db   : > { %v969_v54 = vpack.c.bf16 %v928_v42, %v926_v43  ;;  %v1661_v36 = vpack.c.bf16 %v1620_v19, %v1618_v47 }
 0x1dc   : > { %v970_v29 = vpack.c.bf16 %v929_v13, %v927_v12  ;;  %v1662_v3 = vpack.c.bf16 %v1621_v55, %v1619_v4  ;;  %v843_v14 = vpop.f32.mrb[48].mxu0  ;;  %v1535_v30 = vpop.f32.mrb[48].mxu1 }
 0x1dd   : > { %v844_v18 = vadd.f32 %v843_v14, %v2839_v39  ;;  %v1536_v15 = vadd.f32 %v1535_v30, %v2851_v60  ;;  %v845_v16 = vpop.f32.mrb[49].mxu0  ;;  %v1537_v17 = vpop.f32.mrb[49].mxu1 }
 0x1de   : > { %v846_v20 = vadd.f32 %v845_v16, %v2839_v39  ;;  %v1538_v48 = vadd.f32 %v1537_v17, %v2851_v60  ;;  %v847_v22 = vpop.f32.mrb[50].mxu0  ;;  %1008 = vmatprep.subr.bf16.mxu0 %v970_v29  ;;  %v1539_v9 = vpop.f32.mrb[50].mxu1  ;;  %1700 = vmatprep.subr.bf16.mxu1 %v1662_v3 }
 0x1df   : > { %v848_v51 = vadd.f32 %v847_v22, %v2837_v46  ;;  %v1540_v41 = vadd.f32 %v1539_v9, %v2849_v24  ;;  %v849_v53 = vpop.f32.mrb[51].mxu0  ;;  %1009 = vmatpush1.bf16.msra.mxu0 %v969_v54  ;;  %v1541_v63 = vpop.f32.mrb[51].mxu1  ;;  %1701 = vmatpush1.bf16.msra.mxu1 %v1661_v36  ;;  %v930_v23 = vmax.f32 %v844_v18, 0.0  ;;  %v1622_v39 = vmax.f32 %v1536_v15, 0.0 }
 0x1e0   : > { %v850_v2 = vadd.f32 %v849_v53, %v2837_v46  ;;  %v1542_v50 = vadd.f32 %v1541_v63, %v2849_v24  ;;  %v931_v25 = vmax.f32 %v846_v20, 0.0  ;;  %v1623_v62 = vmax.f32 %v1538_v48, 0.0  ;;  %v1241_v40 = vpop.permute.xlu1 %1240  ;;  %v1236_v45 = vpop.permute.xlu0 %1235 }
 0x1e1   : > { %v932_v44 = vmax.f32 %v848_v51, 0.0  ;;  %v1624_v60 = vmax.f32 %v1540_v41, 0.0 }
 0x1e2   : > { %v933_v26 = vmax.f32 %v850_v2, 0.0  ;;  %v1625_v27 = vmax.f32 %v1542_v50, 0.0 }
 0x1e3   : > { %v971_v49 = vpack.c.bf16 %v932_v44, %v930_v23  ;;  %v1663_v31 = vpack.c.bf16 %v1624_v60, %v1622_v39 }
 0x1e4   : > { %v972_v32 = vpack.c.bf16 %v933_v26, %v931_v25  ;;  %v1664_v21 = vpack.c.bf16 %v1625_v27, %v1623_v62  ;;  %v853_v38 = vpop.f32.mrb[52].mxu0  ;;  %v1545_v59 = vpop.f32.mrb[52].mxu1 }
 0x1e5   : > { %v854_v46 = vadd.f32 %v853_v38, %v2863_v52  ;;  %v1546_v24 = vadd.f32 %v1545_v59, %v2875_v8  ;;  %v855_v33 = vpop.f32.mrb[53].mxu0  ;;  %v1547_v5 = vpop.f32.mrb[53].mxu1 }
 0x1e6   : > { %v856_v34 = vadd.f32 %v855_v33, %v2863_v52  ;;  %v1548_v7 = vadd.f32 %v1547_v5, %v2875_v8  ;;  %v857_v61 = vpop.f32.mrb[54].mxu0  ;;  %1010 = vmatprep.subr.bf16.mxu0 %v972_v32  ;;  %v1549_v56 = vpop.f32.mrb[54].mxu1  ;;  %1702 = vmatprep.subr.bf16.mxu1 %v1664_v21 }
 0x1e7   : > { %v858_v35 = vadd.f32 %v857_v61, %v2861_v6  ;;  %v1550_v58 = vadd.f32 %v1549_v56, %v2873_v28  ;;  %v859_v10 = vpop.f32.mrb[55].mxu0  ;;  %1011 = vmatpush1.bf16.msra.mxu0 %v971_v49  ;;  %v1551_v37 = vpop.f32.mrb[55].mxu1  ;;  %1703 = vmatpush1.bf16.msra.mxu1 %v1663_v31  ;;  %v934_v43 = vmax.f32 %v854_v46, 0.0  ;;  %v1626_v52 = vmax.f32 %v1546_v24, 0.0 }
 0x1e8   : > { %v860_v11 = vadd.f32 %v859_v10, %v2861_v6  ;;  %v1552_v0 = vadd.f32 %v1551_v37, %v2873_v28  ;;  %v935_v42 = vmax.f32 %v856_v34, 0.0  ;;  %v1627_v19 = vmax.f32 %v1548_v7, 0.0  ;;  %v551_v13 = vpop.permute.xlu1 %550  ;;  %v546_v55 = vpop.permute.xlu0 %545 }
 0x1e9   : > { %v936_v47 = vmax.f32 %v858_v35, 0.0  ;;  %v1628_v8 = vmax.f32 %v1550_v58, 0.0 }
 0x1ea   : > { %v937_v12 = vmax.f32 %v860_v11, 0.0  ;;  %v1629_v4 = vmax.f32 %v1552_v0, 0.0 }
 0x1eb   : > { %v973_v54 = vpack.c.bf16 %v936_v47, %v934_v43  ;;  %v1665_v36 = vpack.c.bf16 %v1628_v8, %v1626_v52 }
 0x1ec   : > { %v974_v29 = vpack.c.bf16 %v937_v12, %v935_v42  ;;  %v1666_v3 = vpack.c.bf16 %v1629_v4, %v1627_v19  ;;  %v863_v14 = vpop.f32.mrb[56].mxu0  ;;  %v1555_v30 = vpop.f32.mrb[56].mxu1 }
 0x1ed   : > { %v864_v6 = vadd.f32 %v863_v14, %v2887_v1  ;;  %v1556_v18 = vadd.f32 %v1555_v30, %v1236_v45  ;;  %v865_v28 = vpop.f32.mrb[57].mxu0  ;;  %v1557_v15 = vpop.f32.mrb[57].mxu1 }
 0x1ee   : > { %v866_v16 = vadd.f32 %v865_v28, %v2887_v1  ;;  %v1558_v17 = vadd.f32 %v1557_v15, %v1236_v45  ;;  %v867_v20 = vpop.f32.mrb[58].mxu0  ;;  %1012 = vmatprep.subr.bf16.mxu0 %v974_v29  ;;  %v1559_v48 = vpop.f32.mrb[58].mxu1  ;;  %1704 = vmatprep.subr.bf16.mxu1 %v1666_v3 }
 0x1ef   : > { %v868_v22 = vadd.f32 %v867_v20, %v2885_v57  ;;  %v1560_v9 = vadd.f32 %v1559_v48, %v1241_v40  ;;  %v869_v51 = vpop.f32.mrb[59].mxu0  ;;  %1013 = vmatpush1.bf16.msra.mxu0 %v973_v54  ;;  %v1561_v41 = vpop.f32.mrb[59].mxu1  ;;  %1705 = vmatpush1.bf16.msra.mxu1 %v1665_v36  ;;  %v938_v2 = vmax.f32 %v864_v6, 0.0  ;;  %v1630_v50 = vmax.f32 %v1556_v18, 0.0 }
 0x1f0   : > { %v870_v53 = vadd.f32 %v869_v51, %v2885_v57  ;;  %v1562_v63 = vadd.f32 %v1561_v41, %v1241_v40  ;;  %v939_v1 = vmax.f32 %v866_v16, 0.0  ;;  %v1631_v44 = vmax.f32 %v1558_v17, 0.0  ;;  %v1251_v62 = vpop.permute.xlu1 %1250  ;;  %v1246_v26 = vpop.permute.xlu0 %1245 }
 0x1f1   : > { %v940_v23 = vmax.f32 %v868_v22, 0.0  ;;  %v1632_v39 = vmax.f32 %v1560_v9, 0.0 }
 0x1f2   : > { %v941_v60 = vmax.f32 %v870_v53, 0.0  ;;  %v1633_v25 = vmax.f32 %v1562_v63, 0.0 }
 0x1f3   : > { %v975_v27 = vpack.c.bf16 %v940_v23, %v938_v2  ;;  %v1667_v45 = vpack.c.bf16 %v1632_v39, %v1630_v50 }
 0x1f4   : > { %v976_v49 = vpack.c.bf16 %v941_v60, %v939_v1  ;;  %v1668_v31 = vpack.c.bf16 %v1633_v25, %v1631_v44  ;;  %v873_v32 = vpop.f32.mrb[60].mxu0  ;;  %v1565_v21 = vpop.f32.mrb[60].mxu1 }
 0x1f5   : > { %v874_v38 = vadd.f32 %v873_v32, %v546_v55  ;;  %v1566_v59 = vadd.f32 %v1565_v21, %v1246_v26  ;;  %v875_v57 = vpop.f32.mrb[61].mxu0  ;;  %v1567_v40 = vpop.f32.mrb[61].mxu1 }
 0x1f6   : > { %v876_v46 = vadd.f32 %v875_v57, %v546_v55  ;;  %v1568_v24 = vadd.f32 %v1567_v40, %v1246_v26  ;;  %v877_v33 = vpop.f32.mrb[62].mxu0  ;;  %1014 = vmatprep.subr.bf16.mxu0 %v976_v49  ;;  %v1569_v5 = vpop.f32.mrb[62].mxu1  ;;  %1706 = vmatprep.subr.bf16.mxu1 %v1668_v31  ;;  %v2108_v55 = vld [vmem:[#allocation8] sm:$0xff] }
 0x1f7   : > { %v878_v34 = vadd.f32 %v877_v33, %v551_v13  ;;  %v1570_v7 = vadd.f32 %v1569_v5, %v1251_v62  ;;  %v879_v61 = vpop.f32.mrb[63].mxu0  ;;  %1015 = vmatpush1.bf16.msra.mxu0 %v975_v27  ;;  %v1571_v56 = vpop.f32.mrb[63].mxu1  ;;  %1707 = vmatpush1.bf16.msra.mxu1 %v1667_v45  ;;  %v942_v10 = vmax.f32 %v874_v38, 0.0  ;;  %v1634_v37 = vmax.f32 %v1566_v59, 0.0 }
 0x1f8   : > { %v880_v35 = vadd.f32 %v879_v61, %v551_v13  ;;  %v1572_v58 = vadd.f32 %v1571_v56, %v1251_v62  ;;  %v943_v43 = vmax.f32 %v876_v46, 0.0  ;;  %v1635_v52 = vmax.f32 %v1568_v24, 0.0  ;;  %v2109_v13 = vld [vmem:[#allocation8 + $0x8] sm:$0xff]  ;;  %v326_v29 = vpop.permute.xlu0 %325 }
 0x1f9   : > { %v944_v11 = vmax.f32 %v878_v34, 0.0  ;;  %v1636_v0 = vmax.f32 %v1570_v7, 0.0  ;;  %v1913_v54 = vcombine.low %v2108_v55, %v2108_v55  ;;  %v1948_v36 = vcombine.low %v2109_v13, %v2109_v13 }
 0x1fa   : > { %v945_v47 = vmax.f32 %v880_v35, 0.0  ;;  %v1637_v8 = vmax.f32 %v1572_v58, 0.0 }
 0x1fb   : > { %v977_v42 = vpack.c.bf16 %v944_v11, %v942_v10  ;;  %v1669_v19 = vpack.c.bf16 %v1636_v0, %v1634_v37 }
 0x1fc   : > { %v978_v12 = vpack.c.bf16 %v945_v47, %v943_v43  ;;  %v1670_v4 = vpack.c.bf16 %v1637_v8, %v1635_v52 }
 0x1fe   : > { %1016 = vmatprep.subr.bf16.mxu0 %v978_v12  ;;  %1708 = vmatprep.subr.bf16.mxu1 %v1670_v4 }
 0x1ff   : > { %1017 = vmatpush1.bf16.msra.mxu0 %v977_v42  ;;  %1709 = vmatpush1.bf16.msra.mxu1 %v1669_v19 }
 0x202   : > { %1019 = vmatmul.mubr.bf16.vlgmr.msra.gmra.mrb[64].mxu0 %v1913_v54  ;;  %1711 = vmatmul.mubr.bf16.vlgmr.msra.gmra.mrb[64].mxu1 %v1948_v36 }
 0x2d5   : > { %v1020_v3 = vpop.f32.mrb[64].mxu0  ;;  %v1712_v14 = vpop.f32.mrb[64].mxu1 }
 0x2d6   : > { %v1027_v30 = vadd.f32 %v1020_v3, %v326_v29  ;;  %v1022_v6 = vpop.f32.mrb[65].mxu0  ;;  %v1714_v18 = vpop.f32.mrb[65].mxu1 }
 0x2d7   : > { %v1028_v28 = vadd.f32 %v1022_v6, %v326_v29  ;;  %v1024_v15 = vpop.f32.mrb[66].mxu0  ;;  %v1716_v16 = vpop.f32.mrb[66].mxu1 }
 0x2d8   : > { %v1719_v17 = vadd.f32 %v1712_v14, %v1027_v30  ;;  %v1025_v20 = vpop.f32.mrb[67].mxu0  ;;  %v1717_v48 = vpop.f32.mrb[67].mxu1 }
 0x2d9   : > { %v1720_v22 = vadd.f32 %v1714_v18, %v1028_v28 }
 0x2da   : > { %1721 = vst [vmem:[%s312_s7] sm:$0xff] %v1719_v17 }
 0x2db   : > { %1722 = vst [vmem:[%s312_s7 + $0x8] sm:$0xff] %v1720_v22 }
 0x2dc   : > { %2265 = shalt.err (!%p2262_p8)
}
 0x2dd   : > { %s2266_s30 = scalar_lea.hbm %s2914_s29, 256  ;;  %s2270_s16 = scalar_lea.hbm %s2968_s5, 512 }
 0x2de   : > { %p2267_p3 = scmp.ne.s32.totalorder %s2914_s29, %s2266_s30  ;;  %p2271_p13 = scmp.lt.u32.totalorder %s2914_s29, %s2968_s5 }
 0x2df   : > { %p2272_p12 = scmp.lt.u32.totalorder %s2270_s16, %s2266_s30  ;;  %p2274_p2 = scmp.lt.u32.totalorder %s2266_s30, %s2914_s29 }
 0x2e0   : > { %p2268_p11 = pnand %p2267_p3, %p2985_p9 }
 0x2e1   : > { %p2273_p4 = por %p2272_p12, %p2271_p13 }
 0x2e2   : > { %p2269_p6 = pneg %p2268_p11 }
 0x2e3   : > { %p2275_p10 = por %p2274_p2, %p2273_p4 }
 0x2e5   : > { %p2276_p1 = pnand %p2275_p10, %p2269_p6 }
 0x2e7   : > { %2279 = shalt.err (!%p2276_p1)
}
 0x2e8   : > { %1979 = dma.vmem_to_hbm [thread:$0]  (%p2985_p9), %s2916_s8, 256, %s2914_s29, %s1724_s21  }
 0x2e9 PF: > { %s1752_s7 = sand.u32 1, %s2322_s18   ;;  %p2986_p0 = scmp.ne.s32.totalorder %s2981_s11, 0 }
 0x2ea   : > { %p2987_p7 = scmp.ge.s32.totalorder %s2342_s23, 2  ;;  %s1753_s17 = scalar_lea.sflag [#allocation4], %s1752_s7 }
 0x2ec   : > { %p1999_p5 = pnand %p2987_p7, %p2986_p0 }
 0x2ee   : > { %2317 = dma.done.wait (!%p1999_p5), %s1753_s17, 256  }
 0x2ef   : > { %2319 = vsyncadd (!%p1999_p5), %s1753_s17, 4294967040  ;;  %s23_s23 = sadd.s32 1, %s2342_s23   ;;  %s2988_s18 = smov %s2326_s19 }
 0x2f0   : > { %p20_p8 = scmp.ge.s32.totalorder %s23_s23, 4   ;;  %s2989_s19 = smov %s2330_s20 }
 0x2f1   : > { %s2990_s20 = smov %s2561_s10  ;;  %s2991_s21 = smov %s2338_s22 }
 0x2f2   : > { %s2992_s22 = smov %s2994_s28  ;;  %22 = sbr.rel (!%p20_p8) target bundleno = 8 (0x8), region = 101 }
 0x2f9   :  { %1758 = vsyncpa [#allocation3], 1 }
 0x2fa   :  { %1760 = vsyncpa [#allocation3 + $0x1], 1 }
 0x2fb   :  { %1761 = vsyncpa [#allocation6], 1 }
 0x2fc   :  { %1762 = vsyncpa [#allocation9], 1 }
 0x2fd   :  { %1763 = vsyncpa [#allocation4], 1 }
 0x2fe   :  { %1765 = vsyncpa [#allocation4 + $0x1], 1 }

</bundles_post_ra>
